<compile_context>
chip_gen: v7x
topology: tpu7x:2x2x1
jax: 0.10.0
libtpu: 0.0.40
codegen_flags: <defaults>
</compile_context>

<pallas_src>
import functools

import jax
import jax.numpy as jnp
from jax.experimental import pallas as pl
from jax.experimental.pallas import tpu as pltpu

LEAKY_SLOPE = 0.01   # PyTorch nn.LeakyReLU default
BN_EPS = 1e-5        # PyTorch nn.BatchNorm2d default


def _leaky(x):
    # For 0 < slope < 1, LeakyReLU(x) == max(x, slope*x): one VPU max instead
    # of compare + select.
    return jnp.maximum(x, LEAKY_SLOPE * x)


def _im2col_3x3(h, col_ref, masks_ref, W):
    """Write the 9 zero-padded 3x3-tap shifts of h (Ch, L) into col_ref.

    Tap t = (ky*3 + kx) needs h[:, lane + dy*W + dx] with dy = ky-1, dx = kx-1.
    Each tap is one XLU lane rotation of h followed by a multiply with the
    precomputed (1, L) validity mask for that tap; the mask zeroes both the
    conv zero-padding positions and any rotation wrap-around / image-seam
    leakage (batch images are packed along the lane axis).
    """
    Ch, L = h.shape
    for t in range(9):
        dy = t // 3 - 1
        dx = t % 3 - 1
        s = dy * W + dx                                   # wanted: h[:, lane + s]
        shifted = h if s == 0 else pltpu.roll(h, shift=(-s) % L, axis=1)
        if dy == 0 and dx == 0:
            col_ref[pl.ds(t * Ch, Ch), :] = shifted       # center tap: mask == 1
        else:
            col_ref[pl.ds(t * Ch, Ch), :] = shifted * masks_ref[pl.ds(t, 1), :]


def sfc_kernel(x_ref, masks_ref,
               w1_ref, b1_ref,
               w2_ref, sh2_ref,
               w3_ref, sh3_ref,
               w4_ref, sh4_ref,
               w5_ref, sh5_ref,
               o_ref,
               col2_ref, col3_ref,
               *, W):
    mxu_dt = w1_ref.dtype                                 # f32 or bf16 MXU path
    x = x_ref[0].astype(mxu_dt)                           # (C, B*HW)

    # ---- layer 1: fused 1x1 conv (dense, no BN / activation) -------------
    h1 = jnp.dot(w1_ref[...], x,
                 preferred_element_type=jnp.float32) + b1_ref[...]

    # ---- layer 2: se_conv 3x3 groups=C (C -> E) + BN + LeakyReLU ---------
    _im2col_3x3(h1, col2_ref, masks_ref, W)
    h2 = _leaky(jnp.dot(w2_ref[...], col2_ref[...].astype(mxu_dt),
                        preferred_element_type=jnp.float32) + sh2_ref[...])

    # ---- layer 3: hd_conv 3x3 groups=C (E -> E) + BN + LeakyReLU ---------
    _im2col_3x3(h2, col3_ref, masks_ref, W)
    h3 = _leaky(jnp.dot(w3_ref[...], col3_ref[...].astype(mxu_dt),
                        preferred_element_type=jnp.float32) + sh3_ref[...])

    # ---- layer 4: cp_conv 1x1 groups=C (E -> C) + BN + LeakyReLU ---------
    h4 = _leaky(jnp.dot(w4_ref[...], h3.astype(mxu_dt),
                        preferred_element_type=jnp.float32) + sh4_ref[...])

    # ---- layer 5: pw_conv 1x1 (C -> O) + BN + Tanh, then /2 + 0.5 --------
    if w5_ref.shape[1] == 1:
        # O == 1: VPU broadcast-multiply + cross-sublane reduce (no 1-lane MXU).
        z = jnp.sum(h4 * w5_ref[...], axis=0, keepdims=True) + sh5_ref[...]
    else:
        z = jax.lax.dot_general(w5_ref[...], h4, (((0,), (0,)), ((), ())),
                                preferred_element_type=jnp.float32) + sh5_ref[...]
    o_ref[0] = (jnp.tanh(z) * 0.5 + 0.5).astype(o_ref.dtype)


def _full_spec(arr):
    nd = arr.ndim
    return pl.BlockSpec(arr.shape, lambda g, _nd=nd: (0,) * _nd)


def _make_tap_masks(H, W, B):
    """(9, B*HW) f32 validity mask per 3x3 tap, computed from lane % HW so
    taps never leak across image seams when B images share the lane axis."""
    HW = H * W
    p = jnp.arange(B * HW) % HW
    py = p // W
    px = p % W
    masks = []
    for t in range(9):
        dy, dx = t // 3 - 1, t % 3 - 1
        valid = ((py + dy >= 0) & (py + dy < H) &
                 (px + dx >= 0) & (px + dx < W))
        masks.append(valid.astype(jnp.float32))
    return jnp.stack(masks, axis=0)


def _pick_batch_fold(N, HW, max_lanes):
    """Largest divisor of N whose packed lane width B*HW stays within budget."""
    b = 1
    for cand in range(1, N + 1):
        if N % cand == 0 and cand * HW <= max_lanes:
            b = cand
    return b


def sfc_forward(x_nchw, params, *, mxu_dtype=jnp.float32, max_lanes=2048):
    """x_nchw: (N, C, H, W) float32; params: packed tuple from pack_params.

    mxu_dtype=jnp.bfloat16 uses the native bf16 MXU path on v6e/v7x (dot
    operands only; elementwise math stays f32)."""
    N, C, H, W = x_nchw.shape
    HW = H * W
    E = params[2].shape[0]     # w2: (E, 9*C)
    O = params[8].shape[1]     # w5: (C, O)

    B = _pick_batch_fold(N, HW, max_lanes)   # images packed per grid step
    G = N // B
    BHW = B * HW

    # Pack B images along the lane axis: (G, C, B*HW), lane = b*HW + y*W + x.
    x_packed = (x_nchw.reshape(G, B, C, HW)
                .transpose(0, 2, 1, 3)
                .reshape(G, C, BHW))

    masks = _make_tap_masks(H, W, B)         # (9, B*HW), grid-invariant input

    # Only the MXU weight operands get the (possibly bf16) cast; biases / BN
    # shifts / pw weight stay f32 (added / multiplied on the VPU in f32).
    w1, b1, w2, sh2, w3, sh3, w4, sh4, w5, sh5 = params
    w1, w2, w3, w4 = (w.astype(mxu_dtype) for w in (w1, w2, w3, w4))
    call_params = (w1, b1, w2, sh2, w3, sh3, w4, sh4, w5, sh5)

    in_specs = [pl.BlockSpec((1, C, BHW), lambda g: (g, 0, 0)),
                _full_spec(masks)]
    in_specs += [_full_spec(p) for p in call_params]
    out_specs = pl.BlockSpec((1, O, BHW), lambda g: (g, 0, 0))

    out_flat = pl.pallas_call(
        functools.partial(sfc_kernel, W=W),
        out_shape=jax.ShapeDtypeStruct((G, O, BHW), jnp.float32),
        grid_spec=pltpu.PrefetchScalarGridSpec(
            num_scalar_prefetch=0,
            grid=(G,),                       # folded-batch axis, parallel across TCs
            in_specs=in_specs,
            out_specs=out_specs,
            scratch_shapes=[
                pltpu.VMEM((9 * C, BHW), jnp.float32),   # layer-2 im2col (f32: keeps
                pltpu.VMEM((9 * E, BHW), jnp.float32),   #  t*Ch offsets (8,128)-aligned)
            ]),
        compiler_params=pltpu.CompilerParams(
            dimension_semantics=("parallel",)),
    )(x_packed, masks, *call_params)

    return (out_flat.reshape(G, O, B, HW)
            .transpose(0, 2, 1, 3)
            .reshape(N, O, H, W))


def init_raw_params(key, C, O, expansion=4):
    """Deterministic synthetic parameters in the original PyTorch shapes."""
    E = C * expansion
    keys = jax.random.split(key, 26)
    ki = iter(range(26))

    def rnd(shape, scale=0.1):
        return jax.random.normal(keys[next(ki)], shape, jnp.float32) * scale

    def bn(ch):
        gamma = 1.0 + rnd((ch,))
        beta = rnd((ch,))
        mean = rnd((ch,))
        var = jnp.abs(rnd((ch,))) + 1.0
        return (gamma, beta, mean, var)

    return dict(
        w_fused=rnd((C, C, 1, 1)), b_fused=rnd((C,)),
        w_se=rnd((E, 1, 3, 3)), b_se=rnd((E,)), bn_se=bn(E),
        w_hd=rnd((E, expansion, 3, 3)), b_hd=rnd((E,)), bn_hd=bn(E),
        w_cp=rnd((C, expansion, 1, 1)), b_cp=rnd((C,)), bn_cp=bn(C),
        w_pw=rnd((O, C, 1, 1)), b_pw=rnd((O,)), bn_pw=bn(O),
    )


def pack_params(raw, C, O, expansion):
    """Fold BN (eval mode) into conv weights and expand the grouped convs into
    dense single-matmul weights for the (channels, pixels) kernel layout."""
    E = C * expansion

    def fold(bn_params, conv_bias):
        gamma, beta, mean, var = bn_params
        scale = gamma / jnp.sqrt(var + BN_EPS)
        shift = scale * (conv_bias - mean) + beta
        return scale, shift

    group_of_e = jnp.arange(E) // expansion        # group of each E-channel
    kin = jnp.arange(E) % expansion                # within-group index

    # layer 1: fused 1x1 conv (no BN)
    w1 = raw["w_fused"].reshape(C, C)              # [cout, cin]
    b1 = raw["b_fused"][:, None]                   # (C, 1)

    # layer 2: se_conv grouped 3x3 (C -> E) -> (E, 9*C); im2col row = t*C + cin
    w_se = raw["w_se"].reshape(E, 9)               # taps t = ky*3 + kx
    mask_ec = (group_of_e[:, None] == jnp.arange(C)[None, :]).astype(jnp.float32)
    w2 = (w_se[:, :, None] * mask_ec[:, None, :]).reshape(E, 9 * C)
    sc2, sh2 = fold(raw["bn_se"], raw["b_se"])
    w2 = w2 * sc2[:, None]

    # layer 3: hd_conv grouped 3x3 (E -> E) -> (E, 9*E); im2col row = t*E + ein
    w_hd = raw["w_hd"].reshape(E, expansion, 9)
    gathered = w_hd[:, kin, :]                                   # [eout, ein, t]
    same_group = (group_of_e[:, None] == group_of_e[None, :])    # [eout, ein]
    w3 = jnp.where(same_group[:, :, None], gathered, 0.0)
    w3 = jnp.transpose(w3, (0, 2, 1)).reshape(E, 9 * E)          # [eout, t*E+ein]
    sc3, sh3 = fold(raw["bn_hd"], raw["b_hd"])
    w3 = w3 * sc3[:, None]

    # layer 4: cp_conv grouped 1x1 (E -> C) -> (C, E)
    w_cp = raw["w_cp"].reshape(C, expansion)
    mask_ce = (jnp.arange(C)[:, None] == group_of_e[None, :])    # [cout, ein]
    w4 = jnp.where(mask_ce, w_cp[:, kin], 0.0)
    sc4, sh4 = fold(raw["bn_cp"], raw["b_cp"])
    w4 = w4 * sc4[:, None]

    # layer 5: pw_conv 1x1 (C -> O), scale-folded and transposed to (C, O)
    w_pw = raw["w_pw"].reshape(O, C)
    sc5, sh5 = fold(raw["bn_pw"], raw["b_pw"])
    w5 = (w_pw * sc5[:, None]).T

    return (w1, b1,
            w2, sh2[:, None],
            w3, sh3[:, None],
            w4, sh4[:, None],
            w5, sh5[:, None])


# ---------------- pure-JAX reference (eval-mode module semantics) ------------

def _conv2d(x, w, b, *, padding, groups):
    out = jax.lax.conv_general_dilated(
        x, w, window_strides=(1, 1),
        padding=[(padding, padding), (padding, padding)],
        dimension_numbers=("NCHW", "OIHW", "NCHW"),
        feature_group_count=groups,
        precision=jax.lax.Precision.HIGHEST)
    return out + b[None, :, None, None]


def _bn_eval(x, bn_params):
    gamma, beta, mean, var = bn_params
    s = gamma / jnp.sqrt(var + BN_EPS)
    return x * s[None, :, None, None] + (beta - mean * s)[None, :, None, None]


def sfc_reference(x, raw, groups):
    h = _conv2d(x, raw["w_fused"], raw["b_fused"], padding=0, groups=1)
    h = _leaky(_bn_eval(_conv2d(h, raw["w_se"], raw["b_se"], padding=1,
                                groups=groups), raw["bn_se"]))
    h = _leaky(_bn_eval(_conv2d(h, raw["w_hd"], raw["b_hd"], padding=1,
                                groups=groups), raw["bn_hd"]))
    h = _leaky(_bn_eval(_conv2d(h, raw["w_cp"], raw["b_cp"], padding=0,
                                groups=groups), raw["bn_cp"]))
    h = jnp.tanh(_bn_eval(_conv2d(h, raw["w_pw"], raw["b_pw"], padding=0,
                                  groups=1), raw["bn_pw"])) / 2 + 0.5
    return h


if __name__ == "__main__":
    key = jax.random.PRNGKey(0)
    kx, kp = jax.random.split(key)

    # Small shapes consistent with the module (in_channel=8, expansion=4,
    # out_channel=1), batch=2, 16x16 spatial.
    N, C, H, W = 2, 8, 16, 16
    O, expansion = 1, 4

    x = jax.random.normal(kx, (N, C, H, W), jnp.float32)      # PyTorch NCHW layout
    raw = init_raw_params(kp, C, O, expansion)
    params = pack_params(raw, C, O, expansion)

    ref = sfc_reference(x, raw, groups=C)

    # f32 MXU path: strict equivalence with the lax.conv reference.
    out = jax.block_until_ready(sfc_forward(x, params))
    assert out.shape == (N, O, H, W), out.shape
    assert bool(jnp.all(jnp.isfinite(out)))
    # pw output goes through tanh/2 + 0.5 -> must lie in [0, 1]
    assert bool(jnp.all(out >= 0.0)) and bool(jnp.all(out <= 1.0))
    err_f32 = float(jnp.max(jnp.abs(out - ref)))
    assert err_f32 < 5e-3, f"f32 path: max |kernel - reference| = {err_f32}"

    # bf16-MXU path (the v6e/v7x fast path): looser tolerance through 5
    # chained layers of bf16 matmuls with f32 accumulation.
    out_bf16 = jax.block_until_ready(
        sfc_forward(x, params, mxu_dtype=jnp.bfloat16))
    assert bool(jnp.all(jnp.isfinite(out_bf16)))
    err_bf16 = float(jnp.max(jnp.abs(out_bf16 - ref)))
    assert err_bf16 < 4e-2, f"bf16 path: max |kernel - reference| = {err_bf16}"

    print("KERNEL_OK")
</pallas_src>

<mosaic_0001>
module attributes {stable_mosaic.version = 11 : i64} {
  func.func @sfc_kernel(%arg0: i32, %arg1: memref<1x8x512xf32, #tpu.memory_space<vmem>>, %arg2: memref<9x512xf32, #tpu.memory_space<vmem>>, %arg3: memref<8x8xf32, #tpu.memory_space<vmem>>, %arg4: memref<8x1xf32, #tpu.memory_space<vmem>>, %arg5: memref<32x72xf32, #tpu.memory_space<vmem>>, %arg6: memref<32x1xf32, #tpu.memory_space<vmem>>, %arg7: memref<32x288xf32, #tpu.memory_space<vmem>>, %arg8: memref<32x1xf32, #tpu.memory_space<vmem>>, %arg9: memref<8x32xf32, #tpu.memory_space<vmem>>, %arg10: memref<8x1xf32, #tpu.memory_space<vmem>>, %arg11: memref<8x1xf32, #tpu.memory_space<vmem>>, %arg12: memref<1x1xf32, #tpu.memory_space<vmem>>, %arg13: memref<1x1x512xf32, #tpu.memory_space<vmem>>, %arg14: memref<72x512xf32, #tpu.memory_space<vmem>>, %arg15: memref<288x512xf32, #tpu.memory_space<vmem>>) attributes {dimension_semantics = [#tpu.dimension_semantics<parallel>], iteration_bounds = array<i64: 1>, scalar_prefetch = 0 : i64, scratch_operands = 2 : i64, tpu.core_type = #tpu.core_type<tc>, window_params = [{transform_indices = @transform_0, window_bounds = array<i64: 1, 8, 512>}, {pipeline_mode = #tpu.pipeline_mode<synchronous>, transform_indices = @transform_1, window_bounds = array<i64: 9, 512>}, {pipeline_mode = #tpu.pipeline_mode<synchronous>, transform_indices = @transform_2, window_bounds = array<i64: 8, 8>}, {pipeline_mode = #tpu.pipeline_mode<synchronous>, transform_indices = @transform_3, window_bounds = array<i64: 8, 1>}, {pipeline_mode = #tpu.pipeline_mode<synchronous>, transform_indices = @transform_4, window_bounds = array<i64: 32, 72>}, {pipeline_mode = #tpu.pipeline_mode<synchronous>, transform_indices = @transform_5, window_bounds = array<i64: 32, 1>}, {pipeline_mode = #tpu.pipeline_mode<synchronous>, transform_indices = @transform_6, window_bounds = array<i64: 32, 288>}, {pipeline_mode = #tpu.pipeline_mode<synchronous>, transform_indices = @transform_7, window_bounds = array<i64: 32, 1>}, {pipeline_mode = #tpu.pipeline_mode<synchronous>, transform_indices = @transform_8, window_bounds = array<i64: 8, 32>}, {pipeline_mode = #tpu.pipeline_mode<synchronous>, transform_indices = @transform_9, window_bounds = array<i64: 8, 1>}, {pipeline_mode = #tpu.pipeline_mode<synchronous>, transform_indices = @transform_10, window_bounds = array<i64: 8, 1>}, {pipeline_mode = #tpu.pipeline_mode<synchronous>, transform_indices = @transform_11, window_bounds = array<i64: 1, 1>}, {transform_indices = @transform_12, window_bounds = array<i64: 1, 1, 512>}]} {
    %c0 = arith.constant 0 : index
    %c0_0 = arith.constant 0 : index
    %c0_1 = arith.constant 0 : index
    %0 = vector.load %arg1[%c0, %c0_0, %c0_1] : memref<1x8x512xf32, #tpu.memory_space<vmem>>, vector<1x8x512xf32>
    %1 = vector.shape_cast %0 : vector<1x8x512xf32> to vector<8x512xf32>
    %c0_2 = arith.constant 0 : index
    %c0_3 = arith.constant 0 : index
    %2 = vector.load %arg3[%c0_2, %c0_3] : memref<8x8xf32, #tpu.memory_space<vmem>>, vector<8x8xf32>
    %cst = arith.constant dense<0.000000e+00> : vector<8x512xf32>
    %3 = tpu.matmul %2, %1, %cst {dimension_numbers = #tpu.dot_dimension_numbers<[1], [0], [0], [1], [0, 0, 1, 1], [], []>} : vector<8x8xf32>, vector<8x512xf32>, vector<8x512xf32> -> vector<8x512xf32>
    %c0_4 = arith.constant 0 : index
    %c0_5 = arith.constant 0 : index
    %4 = vector.load %arg4[%c0_4, %c0_5] : memref<8x1xf32, #tpu.memory_space<vmem>>, vector<8x1xf32>
    %5 = vector.broadcast %4 : vector<8x1xf32> to vector<8x512xf32>
    %6 = arith.addf %3, %5 : vector<8x512xf32>
    %c17_i32 = arith.constant 17 : i32
    %7 = tpu.dynamic_rotate %6 by %c17_i32 dim 1 : vector<8x512xf32>, i32 -> vector<8x512xf32>
    %c0_6 = arith.constant 0 : index
    %c0_7 = arith.constant 0 : index
    %8 = vector.load %arg2[%c0_6, %c0_7] : memref<9x512xf32, #tpu.memory_space<vmem>>, vector<1x512xf32>
    %9 = vector.broadcast %8 : vector<1x512xf32> to vector<8x512xf32>
    %10 = arith.mulf %7, %9 : vector<8x512xf32>
    %c0_8 = arith.constant 0 : index
    %c0_9 = arith.constant 0 : index
    %11 = vector.load %arg14[%c0_8, %c0_9] : memref<72x512xf32, #tpu.memory_space<vmem>>, vector<8x512xf32>
    tpu.vector_store %arg14[%c0_8, %c0_9], %10 {strides = array<i32>} : memref<72x512xf32, #tpu.memory_space<vmem>>, vector<8x512xf32>,
    %c16_i32 = arith.constant 16 : i32
    %12 = tpu.dynamic_rotate %6 by %c16_i32 dim 1 : vector<8x512xf32>, i32 -> vector<8x512xf32>
    %c1 = arith.constant 1 : index
    %c0_10 = arith.constant 0 : index
    %13 = vector.load %arg2[%c1, %c0_10] : memref<9x512xf32, #tpu.memory_space<vmem>>, vector<1x512xf32>
    %14 = vector.broadcast %13 : vector<1x512xf32> to vector<8x512xf32>
    %15 = arith.mulf %12, %14 : vector<8x512xf32>
    %c8 = arith.constant 8 : index
    %c0_11 = arith.constant 0 : index
    %16 = vector.load %arg14[%c8, %c0_11] : memref<72x512xf32, #tpu.memory_space<vmem>>, vector<8x512xf32>
    tpu.vector_store %arg14[%c8, %c0_11], %15 {strides = array<i32>} : memref<72x512xf32, #tpu.memory_space<vmem>>, vector<8x512xf32>,
    %c15_i32 = arith.constant 15 : i32
    %17 = tpu.dynamic_rotate %6 by %c15_i32 dim 1 : vector<8x512xf32>, i32 -> vector<8x512xf32>
    %c2 = arith.constant 2 : index
    %c0_12 = arith.constant 0 : index
    %18 = vector.load %arg2[%c2, %c0_12] : memref<9x512xf32, #tpu.memory_space<vmem>>, vector<1x512xf32>
    %19 = vector.broadcast %18 : vector<1x512xf32> to vector<8x512xf32>
    %20 = arith.mulf %17, %19 : vector<8x512xf32>
    %c16 = arith.constant 16 : index
    %c0_13 = arith.constant 0 : index
    %21 = vector.load %arg14[%c16, %c0_13] : memref<72x512xf32, #tpu.memory_space<vmem>>, vector<8x512xf32>
    tpu.vector_store %arg14[%c16, %c0_13], %20 {strides = array<i32>} : memref<72x512xf32, #tpu.memory_space<vmem>>, vector<8x512xf32>,
    %c1_i32 = arith.constant 1 : i32
    %22 = tpu.dynamic_rotate %6 by %c1_i32 dim 1 : vector<8x512xf32>, i32 -> vector<8x512xf32>
    %c3 = arith.constant 3 : index
    %c0_14 = arith.constant 0 : index
    %23 = vector.load %arg2[%c3, %c0_14] : memref<9x512xf32, #tpu.memory_space<vmem>>, vector<1x512xf32>
    %24 = vector.broadcast %23 : vector<1x512xf32> to vector<8x512xf32>
    %25 = arith.mulf %22, %24 : vector<8x512xf32>
    %c24 = arith.constant 24 : index
    %c0_15 = arith.constant 0 : index
    %26 = vector.load %arg14[%c24, %c0_15] : memref<72x512xf32, #tpu.memory_space<vmem>>, vector<8x512xf32>
    tpu.vector_store %arg14[%c24, %c0_15], %25 {strides = array<i32>} : memref<72x512xf32, #tpu.memory_space<vmem>>, vector<8x512xf32>,
    %c32 = arith.constant 32 : index
    %c0_16 = arith.constant 0 : index
    %27 = vector.load %arg14[%c32, %c0_16] : memref<72x512xf32, #tpu.memory_space<vmem>>, vector<8x512xf32>
    tpu.vector_store %arg14[%c32, %c0_16], %6 {strides = array<i32>} : memref<72x512xf32, #tpu.memory_space<vmem>>, vector<8x512xf32>,
    %c511_i32 = arith.constant 511 : i32
    %28 = tpu.dynamic_rotate %6 by %c511_i32 dim 1 : vector<8x512xf32>, i32 -> vector<8x512xf32>
    %c5 = arith.constant 5 : index
    %c0_17 = arith.constant 0 : index
    %29 = vector.load %arg2[%c5, %c0_17] : memref<9x512xf32, #tpu.memory_space<vmem>>, vector<1x512xf32>
    %30 = vector.broadcast %29 : vector<1x512xf32> to vector<8x512xf32>
    %31 = arith.mulf %28, %30 : vector<8x512xf32>
    %c40 = arith.constant 40 : index
    %c0_18 = arith.constant 0 : index
    %32 = vector.load %arg14[%c40, %c0_18] : memref<72x512xf32, #tpu.memory_space<vmem>>, vector<8x512xf32>
    tpu.vector_store %arg14[%c40, %c0_18], %31 {strides = array<i32>} : memref<72x512xf32, #tpu.memory_space<vmem>>, vector<8x512xf32>,
    %c497_i32 = arith.constant 497 : i32
    %33 = tpu.dynamic_rotate %6 by %c497_i32 dim 1 : vector<8x512xf32>, i32 -> vector<8x512xf32>
    %c6 = arith.constant 6 : index
    %c0_19 = arith.constant 0 : index
    %34 = vector.load %arg2[%c6, %c0_19] : memref<9x512xf32, #tpu.memory_space<vmem>>, vector<1x512xf32>
    %35 = vector.broadcast %34 : vector<1x512xf32> to vector<8x512xf32>
    %36 = arith.mulf %33, %35 : vector<8x512xf32>
    %c48 = arith.constant 48 : index
    %c0_20 = arith.constant 0 : index
    %37 = vector.load %arg14[%c48, %c0_20] : memref<72x512xf32, #tpu.memory_space<vmem>>, vector<8x512xf32>
    tpu.vector_store %arg14[%c48, %c0_20], %36 {strides = array<i32>} : memref<72x512xf32, #tpu.memory_space<vmem>>, vector<8x512xf32>,
    %c496_i32 = arith.constant 496 : i32
    %38 = tpu.dynamic_rotate %6 by %c496_i32 dim 1 : vector<8x512xf32>, i32 -> vector<8x512xf32>
    %c7 = arith.constant 7 : index
    %c0_21 = arith.constant 0 : index
    %39 = vector.load %arg2[%c7, %c0_21] : memref<9x512xf32, #tpu.memory_space<vmem>>, vector<1x512xf32>
    %40 = vector.broadcast %39 : vector<1x512xf32> to vector<8x512xf32>
    %41 = arith.mulf %38, %40 : vector<8x512xf32>
    %c56 = arith.constant 56 : index
    %c0_22 = arith.constant 0 : index
    %42 = vector.load %arg14[%c56, %c0_22] : memref<72x512xf32, #tpu.memory_space<vmem>>, vector<8x512xf32>
    tpu.vector_store %arg14[%c56, %c0_22], %41 {strides = array<i32>} : memref<72x512xf32, #tpu.memory_space<vmem>>, vector<8x512xf32>,
    %c495_i32 = arith.constant 495 : i32
    %43 = tpu.dynamic_rotate %6 by %c495_i32 dim 1 : vector<8x512xf32>, i32 -> vector<8x512xf32>
    %c8_23 = arith.constant 8 : index
    %c0_24 = arith.constant 0 : index
    %44 = vector.load %arg2[%c8_23, %c0_24] : memref<9x512xf32, #tpu.memory_space<vmem>>, vector<1x512xf32>
    %45 = vector.broadcast %44 : vector<1x512xf32> to vector<8x512xf32>
    %46 = arith.mulf %43, %45 : vector<8x512xf32>
    %c64 = arith.constant 64 : index
    %c0_25 = arith.constant 0 : index
    %47 = vector.load %arg14[%c64, %c0_25] : memref<72x512xf32, #tpu.memory_space<vmem>>, vector<8x512xf32>
    tpu.vector_store %arg14[%c64, %c0_25], %46 {strides = array<i32>} : memref<72x512xf32, #tpu.memory_space<vmem>>, vector<8x512xf32>,
    %c0_26 = arith.constant 0 : index
    %c0_27 = arith.constant 0 : index
    %48 = vector.load %arg5[%c0_26, %c0_27] : memref<32x72xf32, #tpu.memory_space<vmem>>, vector<32x72xf32>
    %c0_28 = arith.constant 0 : index
    %c0_29 = arith.constant 0 : index
    %49 = vector.load %arg14[%c0_28, %c0_29] : memref<72x512xf32, #tpu.memory_space<vmem>>, vector<72x512xf32>
    %cst_30 = arith.constant dense<0.000000e+00> : vector<32x512xf32>
    %50 = tpu.matmul %48, %49, %cst_30 {dimension_numbers = #tpu.dot_dimension_numbers<[1], [0], [0], [1], [0, 0, 1, 1], [], []>} : vector<32x72xf32>, vector<72x512xf32>, vector<32x512xf32> -> vector<32x512xf32>
    %c0_31 = arith.constant 0 : index
    %c0_32 = arith.constant 0 : index
    %51 = vector.load %arg6[%c0_31, %c0_32] : memref<32x1xf32, #tpu.memory_space<vmem>>, vector<32x1xf32>
    %52 = vector.broadcast %51 : vector<32x1xf32> to vector<32x512xf32>
    %53 = arith.addf %50, %52 : vector<32x512xf32>
    %cst_33 = arith.constant 0.00999999977 : f32
    %54 = vector.broadcast %cst_33 : f32 to vector<32x512xf32>
    %55 = arith.mulf %54, %53 : vector<32x512xf32>
    %56 = arith.maximumf %53, %55 : vector<32x512xf32>
    %c17_i32_34 = arith.constant 17 : i32
    %57 = tpu.dynamic_rotate %56 by %c17_i32_34 dim 1 : vector<32x512xf32>, i32 -> vector<32x512xf32>
    %c0_35 = arith.constant 0 : index
    %c0_36 = arith.constant 0 : index
    %58 = vector.load %arg2[%c0_35, %c0_36] : memref<9x512xf32, #tpu.memory_space<vmem>>, vector<1x512xf32>
    %59 = vector.broadcast %58 : vector<1x512xf32> to vector<32x512xf32>
    %60 = arith.mulf %57, %59 : vector<32x512xf32>
    %c0_37 = arith.constant 0 : index
    %c0_38 = arith.constant 0 : index
    %61 = vector.load %arg15[%c0_37, %c0_38] : memref<288x512xf32, #tpu.memory_space<vmem>>, vector<32x512xf32>
    tpu.vector_store %arg15[%c0_37, %c0_38], %60 {strides = array<i32>} : memref<288x512xf32, #tpu.memory_space<vmem>>, vector<32x512xf32>,
    %c16_i32_39 = arith.constant 16 : i32
    %62 = tpu.dynamic_rotate %56 by %c16_i32_39 dim 1 : vector<32x512xf32>, i32 -> vector<32x512xf32>
    %c1_40 = arith.constant 1 : index
    %c0_41 = arith.constant 0 : index
    %63 = vector.load %arg2[%c1_40, %c0_41] : memref<9x512xf32, #tpu.memory_space<vmem>>, vector<1x512xf32>
    %64 = vector.broadcast %63 : vector<1x512xf32> to vector<32x512xf32>
    %65 = arith.mulf %62, %64 : vector<32x512xf32>
    %c32_42 = arith.constant 32 : index
    %c0_43 = arith.constant 0 : index
    %66 = vector.load %arg15[%c32_42, %c0_43] : memref<288x512xf32, #tpu.memory_space<vmem>>, vector<32x512xf32>
    tpu.vector_store %arg15[%c32_42, %c0_43], %65 {strides = array<i32>} : memref<288x512xf32, #tpu.memory_space<vmem>>, vector<32x512xf32>,
    %c15_i32_44 = arith.constant 15 : i32
    %67 = tpu.dynamic_rotate %56 by %c15_i32_44 dim 1 : vector<32x512xf32>, i32 -> vector<32x512xf32>
    %c2_45 = arith.constant 2 : index
    %c0_46 = arith.constant 0 : index
    %68 = vector.load %arg2[%c2_45, %c0_46] : memref<9x512xf32, #tpu.memory_space<vmem>>, vector<1x512xf32>
    %69 = vector.broadcast %68 : vector<1x512xf32> to vector<32x512xf32>
    %70 = arith.mulf %67, %69 : vector<32x512xf32>
    %c64_47 = arith.constant 64 : index
    %c0_48 = arith.constant 0 : index
    %71 = vector.load %arg15[%c64_47, %c0_48] : memref<288x512xf32, #tpu.memory_space<vmem>>, vector<32x512xf32>
    tpu.vector_store %arg15[%c64_47, %c0_48], %70 {strides = array<i32>} : memref<288x512xf32, #tpu.memory_space<vmem>>, vector<32x512xf32>,
    %c1_i32_49 = arith.constant 1 : i32
    %72 = tpu.dynamic_rotate %56 by %c1_i32_49 dim 1 : vector<32x512xf32>, i32 -> vector<32x512xf32>
    %c3_50 = arith.constant 3 : index
    %c0_51 = arith.constant 0 : index
    %73 = vector.load %arg2[%c3_50, %c0_51] : memref<9x512xf32, #tpu.memory_space<vmem>>, vector<1x512xf32>
    %74 = vector.broadcast %73 : vector<1x512xf32> to vector<32x512xf32>
    %75 = arith.mulf %72, %74 : vector<32x512xf32>
    %c96 = arith.constant 96 : index
    %c0_52 = arith.constant 0 : index
    %76 = vector.load %arg15[%c96, %c0_52] : memref<288x512xf32, #tpu.memory_space<vmem>>, vector<32x512xf32>
    tpu.vector_store %arg15[%c96, %c0_52], %75 {strides = array<i32>} : memref<288x512xf32, #tpu.memory_space<vmem>>, vector<32x512xf32>,
    %c128 = arith.constant 128 : index
    %c0_53 = arith.constant 0 : index
    %77 = vector.load %arg15[%c128, %c0_53] : memref<288x512xf32, #tpu.memory_space<vmem>>, vector<32x512xf32>
    tpu.vector_store %arg15[%c128, %c0_53], %56 {strides = array<i32>} : memref<288x512xf32, #tpu.memory_space<vmem>>, vector<32x512xf32>,
    %c511_i32_54 = arith.constant 511 : i32
    %78 = tpu.dynamic_rotate %56 by %c511_i32_54 dim 1 : vector<32x512xf32>, i32 -> vector<32x512xf32>
    %c5_55 = arith.constant 5 : index
    %c0_56 = arith.constant 0 : index
    %79 = vector.load %arg2[%c5_55, %c0_56] : memref<9x512xf32, #tpu.memory_space<vmem>>, vector<1x512xf32>
    %80 = vector.broadcast %79 : vector<1x512xf32> to vector<32x512xf32>
    %81 = arith.mulf %78, %80 : vector<32x512xf32>
    %c160 = arith.constant 160 : index
    %c0_57 = arith.constant 0 : index
    %82 = vector.load %arg15[%c160, %c0_57] : memref<288x512xf32, #tpu.memory_space<vmem>>, vector<32x512xf32>
    tpu.vector_store %arg15[%c160, %c0_57], %81 {strides = array<i32>} : memref<288x512xf32, #tpu.memory_space<vmem>>, vector<32x512xf32>,
    %c497_i32_58 = arith.constant 497 : i32
    %83 = tpu.dynamic_rotate %56 by %c497_i32_58 dim 1 : vector<32x512xf32>, i32 -> vector<32x512xf32>
    %c6_59 = arith.constant 6 : index
    %c0_60 = arith.constant 0 : index
    %84 = vector.load %arg2[%c6_59, %c0_60] : memref<9x512xf32, #tpu.memory_space<vmem>>, vector<1x512xf32>
    %85 = vector.broadcast %84 : vector<1x512xf32> to vector<32x512xf32>
    %86 = arith.mulf %83, %85 : vector<32x512xf32>
    %c192 = arith.constant 192 : index
    %c0_61 = arith.constant 0 : index
    %87 = vector.load %arg15[%c192, %c0_61] : memref<288x512xf32, #tpu.memory_space<vmem>>, vector<32x512xf32>
    tpu.vector_store %arg15[%c192, %c0_61], %86 {strides = array<i32>} : memref<288x512xf32, #tpu.memory_space<vmem>>, vector<32x512xf32>,
    %c496_i32_62 = arith.constant 496 : i32
    %88 = tpu.dynamic_rotate %56 by %c496_i32_62 dim 1 : vector<32x512xf32>, i32 -> vector<32x512xf32>
    %c7_63 = arith.constant 7 : index
    %c0_64 = arith.constant 0 : index
    %89 = vector.load %arg2[%c7_63, %c0_64] : memref<9x512xf32, #tpu.memory_space<vmem>>, vector<1x512xf32>
    %90 = vector.broadcast %89 : vector<1x512xf32> to vector<32x512xf32>
    %91 = arith.mulf %88, %90 : vector<32x512xf32>
    %c224 = arith.constant 224 : index
    %c0_65 = arith.constant 0 : index
    %92 = vector.load %arg15[%c224, %c0_65] : memref<288x512xf32, #tpu.memory_space<vmem>>, vector<32x512xf32>
    tpu.vector_store %arg15[%c224, %c0_65], %91 {strides = array<i32>} : memref<288x512xf32, #tpu.memory_space<vmem>>, vector<32x512xf32>,
    %c495_i32_66 = arith.constant 495 : i32
    %93 = tpu.dynamic_rotate %56 by %c495_i32_66 dim 1 : vector<32x512xf32>, i32 -> vector<32x512xf32>
    %c8_67 = arith.constant 8 : index
    %c0_68 = arith.constant 0 : index
    %94 = vector.load %arg2[%c8_67, %c0_68] : memref<9x512xf32, #tpu.memory_space<vmem>>, vector<1x512xf32>
    %95 = vector.broadcast %94 : vector<1x512xf32> to vector<32x512xf32>
    %96 = arith.mulf %93, %95 : vector<32x512xf32>
    %c256 = arith.constant 256 : index
    %c0_69 = arith.constant 0 : index
    %97 = vector.load %arg15[%c256, %c0_69] : memref<288x512xf32, #tpu.memory_space<vmem>>, vector<32x512xf32>
    tpu.vector_store %arg15[%c256, %c0_69], %96 {strides = array<i32>} : memref<288x512xf32, #tpu.memory_space<vmem>>, vector<32x512xf32>,
    %c0_70 = arith.constant 0 : index
    %c0_71 = arith.constant 0 : index
    %98 = vector.load %arg7[%c0_70, %c0_71] : memref<32x288xf32, #tpu.memory_space<vmem>>, vector<32x288xf32>
    %c0_72 = arith.constant 0 : index
    %c0_73 = arith.constant 0 : index
    %99 = vector.load %arg15[%c0_72, %c0_73] : memref<288x512xf32, #tpu.memory_space<vmem>>, vector<288x512xf32>
    %cst_74 = arith.constant dense<0.000000e+00> : vector<32x512xf32>
    %100 = tpu.matmul %98, %99, %cst_74 {dimension_numbers = #tpu.dot_dimension_numbers<[1], [0], [0], [1], [0, 0, 1, 1], [], []>} : vector<32x288xf32>, vector<288x512xf32>, vector<32x512xf32> -> vector<32x512xf32>
    %c0_75 = arith.constant 0 : index
    %c0_76 = arith.constant 0 : index
    %101 = vector.load %arg8[%c0_75, %c0_76] : memref<32x1xf32, #tpu.memory_space<vmem>>, vector<32x1xf32>
    %102 = vector.broadcast %101 : vector<32x1xf32> to vector<32x512xf32>
    %103 = arith.addf %100, %102 : vector<32x512xf32>
    %cst_77 = arith.constant 0.00999999977 : f32
    %104 = vector.broadcast %cst_77 : f32 to vector<32x512xf32>
    %105 = arith.mulf %104, %103 : vector<32x512xf32>
    %106 = arith.maximumf %103, %105 : vector<32x512xf32>
    %c0_78 = arith.constant 0 : index
    %c0_79 = arith.constant 0 : index
    %107 = vector.load %arg9[%c0_78, %c0_79] : memref<8x32xf32, #tpu.memory_space<vmem>>, vector<8x32xf32>
    %cst_80 = arith.constant dense<0.000000e+00> : vector<8x512xf32>
    %108 = tpu.matmul %107, %106, %cst_80 {dimension_numbers = #tpu.dot_dimension_numbers<[1], [0], [0], [1], [0, 0, 1, 1], [], []>} : vector<8x32xf32>, vector<32x512xf32>, vector<8x512xf32> -> vector<8x512xf32>
    %c0_81 = arith.constant 0 : index
    %c0_82 = arith.constant 0 : index
    %109 = vector.load %arg10[%c0_81, %c0_82] : memref<8x1xf32, #tpu.memory_space<vmem>>, vector<8x1xf32>
    %110 = vector.broadcast %109 : vector<8x1xf32> to vector<8x512xf32>
    %111 = arith.addf %108, %110 : vector<8x512xf32>
    %cst_83 = arith.constant 0.00999999977 : f32
    %112 = vector.broadcast %cst_83 : f32 to vector<8x512xf32>
    %113 = arith.mulf %112, %111 : vector<8x512xf32>
    %114 = arith.maximumf %111, %113 : vector<8x512xf32>
    %c0_84 = arith.constant 0 : index
    %c0_85 = arith.constant 0 : index
    %115 = vector.load %arg11[%c0_84, %c0_85] : memref<8x1xf32, #tpu.memory_space<vmem>>, vector<8x1xf32>
    %116 = vector.broadcast %115 : vector<8x1xf32> to vector<8x512xf32>
    %117 = arith.mulf %114, %116 : vector<8x512xf32>
    %cst_86 = arith.constant dense<0.000000e+00> : vector<512xf32>
    %118 = vector.multi_reduction <add>, %117, %cst_86 [0] : vector<8x512xf32> to vector<512xf32>
    %119 = vector.shape_cast %118 : vector<512xf32> to vector<1x512xf32>
    %c0_87 = arith.constant 0 : index
    %c0_88 = arith.constant 0 : index
    %120 = vector.load %arg12[%c0_87, %c0_88] : memref<1x1xf32, #tpu.memory_space<vmem>>, vector<1x1xf32>
    %121 = vector.broadcast %120 : vector<1x1xf32> to vector<1x512xf32>
    %122 = arith.addf %119, %121 : vector<1x512xf32>
    %123 = math.tanh %122 : vector<1x512xf32>
    %cst_89 = arith.constant 5.000000e-01 : f32
    %124 = vector.broadcast %cst_89 : f32 to vector<1x512xf32>
    %125 = arith.mulf %123, %124 : vector<1x512xf32>
    %cst_90 = arith.constant 5.000000e-01 : f32
    %126 = vector.broadcast %cst_90 : f32 to vector<1x512xf32>
    %127 = arith.addf %125, %126 : vector<1x512xf32>
    %c0_91 = arith.constant 0 : index
    %c0_92 = arith.constant 0 : index
    %c0_93 = arith.constant 0 : index
    %128 = vector.load %arg13[%c0_91, %c0_92, %c0_93] : memref<1x1x512xf32, #tpu.memory_space<vmem>>, vector<1x1x512xf32>
    %129 = vector.shape_cast %128 : vector<1x1x512xf32> to vector<1x512xf32>
    %130 = vector.shape_cast %127 : vector<1x512xf32> to vector<1x1x512xf32>
    tpu.vector_store %arg13[%c0_91, %c0_92, %c0_93], %130 {strides = array<i32>} : memref<1x1x512xf32, #tpu.memory_space<vmem>>, vector<1x1x512xf32>,
    return
  }
  func.func @transform_0(%arg0: i32) -> (i32, i32, i32) {
    %c0_i32 = arith.constant 0 : i32
    %c0_i32_0 = arith.constant 0 : i32
    %c0_i32_1 = arith.constant 0 : i32
    return %arg0, %c0_i32, %c0_i32_0 : i32, i32, i32
  }
  func.func @transform_1(%arg0: i32) -> (i32, i32) {
    %c0_i32 = arith.constant 0 : i32
    %c0_i32_0 = arith.constant 0 : i32
    %c0_i32_1 = arith.constant 0 : i32
    return %c0_i32, %c0_i32_0 : i32, i32
  }
  func.func @transform_2(%arg0: i32) -> (i32, i32) {
    %c0_i32 = arith.constant 0 : i32
    %c0_i32_0 = arith.constant 0 : i32
    %c0_i32_1 = arith.constant 0 : i32
    return %c0_i32, %c0_i32_0 : i32, i32
  }
  func.func @transform_3(%arg0: i32) -> (i32, i32) {
    %c0_i32 = arith.constant 0 : i32
    %c0_i32_0 = arith.constant 0 : i32
    %c0_i32_1 = arith.constant 0 : i32
    return %c0_i32, %c0_i32_0 : i32, i32
  }
  func.func @transform_4(%arg0: i32) -> (i32, i32) {
    %c0_i32 = arith.constant 0 : i32
    %c0_i32_0 = arith.constant 0 : i32
    %c0_i32_1 = arith.constant 0 : i32
    return %c0_i32, %c0_i32_0 : i32, i32
  }
  func.func @transform_5(%arg0: i32) -> (i32, i32) {
    %c0_i32 = arith.constant 0 : i32
    %c0_i32_0 = arith.constant 0 : i32
    %c0_i32_1 = arith.constant 0 : i32
    return %c0_i32, %c0_i32_0 : i32, i32
  }
  func.func @transform_6(%arg0: i32) -> (i32, i32) {
    %c0_i32 = arith.constant 0 : i32
    %c0_i32_0 = arith.constant 0 : i32
    %c0_i32_1 = arith.constant 0 : i32
    return %c0_i32, %c0_i32_0 : i32, i32
  }
  func.func @transform_7(%arg0: i32) -> (i32, i32) {
    %c0_i32 = arith.constant 0 : i32
    %c0_i32_0 = arith.constant 0 : i32
    %c0_i32_1 = arith.constant 0 : i32
    return %c0_i32, %c0_i32_0 : i32, i32
  }
  func.func @transform_8(%arg0: i32) -> (i32, i32) {
    %c0_i32 = arith.constant 0 : i32
    %c0_i32_0 = arith.constant 0 : i32
    %c0_i32_1 = arith.constant 0 : i32
    return %c0_i32, %c0_i32_0 : i32, i32
  }
  func.func @transform_9(%arg0: i32) -> (i32, i32) {
    %c0_i32 = arith.constant 0 : i32
    %c0_i32_0 = arith.constant 0 : i32
    %c0_i32_1 = arith.constant 0 : i32
    return %c0_i32, %c0_i32_0 : i32, i32
  }
  func.func @transform_10(%arg0: i32) -> (i32, i32) {
    %c0_i32 = arith.constant 0 : i32
    %c0_i32_0 = arith.constant 0 : i32
    %c0_i32_1 = arith.constant 0 : i32
    return %c0_i32, %c0_i32_0 : i32, i32
  }
  func.func @transform_11(%arg0: i32) -> (i32, i32) {
    %c0_i32 = arith.constant 0 : i32
    %c0_i32_0 = arith.constant 0 : i32
    %c0_i32_1 = arith.constant 0 : i32
    return %c0_i32, %c0_i32_0 : i32, i32
  }
  func.func @transform_12(%arg0: i32) -> (i32, i32, i32) {
    %c0_i32 = arith.constant 0 : i32
    %c0_i32_0 = arith.constant 0 : i32
    %c0_i32_1 = arith.constant 0 : i32
    return %arg0, %c0_i32, %c0_i32_0 : i32, i32, i32
  }
}

</mosaic_0001>

<bundles_post_ra>
// kernel: tpu_custom_call.1
= control target key start
LH: loop header
LB: loop body
LE: loop exit
PB: predicated region body
PF: predicated region fallthrough
CT: control target
= control target key end

     0   :  { %s4721_s0 = inlined_call_operand.hbm [shape: f32[1,8,512], index: 0, kind: input, shape index: {}]   ;;  %s4722_s1 = inlined_call_operand.hbm [shape: f32[9,512], index: 1, kind: input, shape index: {}]   ;;  %s4723_s2 = inlined_call_operand.vmem [shape: f32[8,8], index: 2, kind: input, shape index: {}]   ;;  %s4724_s3 = inlined_call_operand.vmem [shape: f32[8,1], index: 3, kind: input, shape index: {}]   ;;  %s4725_s4 = inlined_call_operand.hbm [shape: f32[32,72], index: 4, kind: input, shape index: {}]   ;;  %s4726_s5 = inlined_call_operand.vmem [shape: f32[32,1], index: 5, kind: input, shape index: {}]   ;;  %s4727_s6 = inlined_call_operand.vmem [shape: f32[32,288], index: 6, kind: input, shape index: {}]   ;;  %s4728_s7 = inlined_call_operand.vmem [shape: f32[32,1], index: 7, kind: input, shape index: {}]   ;;  %s4729_s8 = inlined_call_operand.vmem [shape: f32[8,32], index: 8, kind: input, shape index: {}]   ;;  %s4730_s9 = inlined_call_operand.vmem [shape: f32[8,1], index: 9, kind: input, shape index: {}]   ;;  %s4731_s10 = inlined_call_operand.vmem [shape: f32[8,1], index: 10, kind: input, shape index: {}]   ;;  %s4732_s11 = inlined_call_operand.<no memory space> [shape: f32[1,1], index: 11, kind: input, shape index: {}]   ;;  %s4733_s12 = inlined_call_operand.hbm [shape: f32[1,1,512], index: 12, kind: output, shape index: {}]  }
   0x1   :  { %v17_v0 = vstv %s4732_s11 }
   0x2   :  { %18 = vst [vmem:[#allocation4] sm:$0x1] %v17_v0 }
   0x3   :  { %19 = vsyncpa [#allocation6], 0 }
   0x4   :  { %20 = vsyncpa [#allocation9], 0 }
   0x5   :  { %21 = vsyncpa [#allocation7], 0  ;;  %s2934_s23 = smov [#allocation8]   ;;  %s2840_s27 = scalar_lea.hbm %s4722_s1, 1024 }
   0x6   :  { %s37_s24 = sshll.u32 %s2934_s23, 4  ;;  %p2841_p0 = scmp.ne.s32.totalorder %s4722_s1, %s2840_s27  ;;  %s38_s24 = int_to_ptr.vmem [resolvable:$true] %s37_s24 }
   0x7   :  { %p2844_p1 = scmp.lt.u32.totalorder %s2840_s27, %s4722_s1 }
   0x9   :  { %p2846_p2 = pnand %p2844_p1, %p2841_p0 }
   0xb   :  { %2849 = shalt.err (!%p2846_p2)
}
   0xc   :  { %s2850_s11 = scalar_lea.vmem %s38_s24, 1024  ;;  %p2855_p4 = scmp.lt.s32.totalorder %s38_s24, %s38_s24 }
   0xd   :  { %p2851_p3 = scmp.ne.s32.totalorder %s38_s24, %s2850_s11  ;;  %p2856_p5 = scmp.lt.s32.totalorder %s2850_s11, %s2850_s11 }
   0xf   :  { %p2857_p6 = por %p2856_p5, %p2855_p4 }
  0x11   :  { %p2858_p7 = pnand %p2857_p6, %p2851_p3 }
  0x13   :  { %2861 = shalt.err (!%p2858_p7)
}
  0x14   :  { %s2935_s14 = smov 512   ;;  %s2936_s15 = smov 32  }
  0x15   :  { %43 = dma.hbm_to_vmem [thread:$0]  %s4722_s1, 1024, %s38_s24, [#allocation9], %s2935_s14, %s2935_s14, %s2936_s15  }
  0x16   :  { %s2937_s18 = smov [#allocation5]   ;;  %s2938_s20 = smov [#allocation10]  }
  0x17   :  { %s28_s19 = sshll.u32 %s2937_s18, 4  ;;  %s53_s21 = sshll.u32 %s2938_s20, 4  ;;  %s29_s19 = int_to_ptr.vmem [resolvable:$true] %s28_s19  ;;  %s54_s21 = int_to_ptr.vmem [resolvable:$true] %s53_s21 }
  0x18   :  { %s2862_s25 = scalar_lea.hbm %s4721_s0, 512 }
  0x19   :  { %p2863_p8 = scmp.ne.s32.totalorder %s4721_s0, %s2862_s25  ;;  %p2866_p9 = scmp.lt.u32.totalorder %s2862_s25, %s4721_s0 }
  0x1b   :  { %p2868_p10 = pnand %p2866_p9, %p2863_p8 }
  0x1d   :  { %2871 = shalt.err (!%p2868_p10)
}
  0x1e   :  { %s2872_s1 = scalar_lea.vmem %s29_s19, 512  ;;  %p2877_p12 = scmp.lt.s32.totalorder %s29_s19, %s29_s19 }
  0x1f   :  { %p2873_p11 = scmp.ne.s32.totalorder %s29_s19, %s2872_s1  ;;  %p2878_p13 = scmp.lt.s32.totalorder %s2872_s1, %s2872_s1 }
  0x21   :  { %p2879_p0 = por %p2878_p13, %p2877_p12 }
  0x23   :  { %p2880_p1 = pnand %p2879_p0, %p2873_p11 }
  0x25   :  { %2883 = shalt.err (!%p2880_p1)
}
  0x26   :  { %31 = dma.hbm_to_vmem [thread:$0]  %s4721_s0, 512, %s29_s19, [#allocation6]  }
  0x27   :  { %s2884_s14 = scalar_lea.hbm %s4725_s4, 512 }
  0x28   :  { %p2885_p2 = scmp.ne.s32.totalorder %s4725_s4, %s2884_s14  ;;  %p2888_p3 = scmp.lt.u32.totalorder %s2884_s14, %s4725_s4 }
  0x2a   :  { %p2890_p4 = pnand %p2888_p3, %p2885_p2 }
  0x2c   :  { %2893 = shalt.err (!%p2890_p4)
}
  0x2d   :  { %s2894_s20 = scalar_lea.vmem %s54_s21, 512  ;;  %p2899_p6 = scmp.lt.s32.totalorder %s54_s21, %s54_s21 }
  0x2e   :  { %p2895_p5 = scmp.ne.s32.totalorder %s54_s21, %s2894_s20  ;;  %p2900_p7 = scmp.lt.s32.totalorder %s2894_s20, %s2894_s20 }
  0x30   :  { %p2901_p8 = por %p2900_p7, %p2899_p6 }
  0x32   :  { %p2902_p9 = pnand %p2901_p8, %p2895_p5 }
  0x34   :  { %2905 = shalt.err (!%p2902_p9)
}
  0x35   :  { %s2939_s0 = smov 128   ;;  %s2940_s19 = smov 8  }
  0x36   :  { %59 = dma.hbm_to_vmem [thread:$0]  %s4725_s4, 512, %s54_s21, [#allocation9], %s2939_s0, %s2939_s0, %s2940_s19  }
  0x37   :  { %2928 = dma.done.wait [#allocation6], 512  }
  0x38   :  { %2929 = vsyncadd [#allocation6], 4294966784 }
  0x39   :  { %2930 = dma.done.wait [#allocation9], 1536  }
  0x3a   :  { %2931 = vsyncadd [#allocation9], 4294965760  ;;  %v4735_v1 = vmov 0.0   ;;  %v2942_v2 = vmov 0   ;;  %v84_v3 = vld [vmem:[#allocation5 + $0x8] sm:$0xff]  ;;  %v86_v4 = vld [vmem:[#allocation5 + $0x18] sm:$0xff]  ;;  %v4734_v22 = vlaneseq }
  0x3b   :  { %162 = vmatprep.mubr.f32.mxu0 %v4735_v1  ;;  %233 = vmatprep.mubr.f32.mxu1 %v4735_v1  ;;  %v83_v5 = vld [vmem:[#allocation5] sm:$0xff]  ;;  %vm94_vm0 = vcmask 64512   ;;  %v85_v6 = vld [vmem:[#allocation5 + $0x10] sm:$0xff]  ;;  %s2945_s27 = smov 15   ;;  %s2946_s28 = smov 1   ;;  %vm661_vm9 = vcmask 588800  }
  0x3c   :  { %2830 = vset.pattern.permute.xlu0 %v2942_v2  ;;  %2831 = vset.pattern.permute.xlu1 %v2942_v2  ;;  %v87_v7 = vld [vmem:[%s4723_s2] sm:$0xff]  ;;  %s2943_s2 = smov 17   ;;  %s2947_s29 = smov 127   ;;  %v638_v18 = vld [vmem:[%s4726_s5 + $0x8] sm:$0xff]  ;;  %v640_v19 = vld [vmem:[%s4726_s5 + $0x18] sm:$0xff]  ;;  %v3156_v25 = vshrl.u32 %v4734_v22, 7 }
  0x3d   :  { %98 = vmatprep.subr.mxu0 %v84_v3  ;;  %169 = vmatprep.subr.mxu1 %v86_v4  ;;  %v88_v8 = vld [vmem:[%s4724_s3] sm:$0xff]  ;;  %s2944_s3 = smov 16   ;;  %s2948_s1 = smov 113   ;;  %v639_v21 = vld [vmem:[%s4726_s5 + $0x10] sm:$0xff]  ;;  %v3159_v27 = vand.u32 127, %v4734_v22  ;;  %vm1896_vm10 = vcmask 261120  }
  0x3e   :  { %99 = vmatpush1.msra.mxu0 %v83_v5  ;;  %170 = vmatpush1.msra.mxu1 %v85_v6  ;;  %s2949_s24 = smov 112   ;;  %s2950_s30 = smov 111   ;;  %v637_v20 = vld [vmem:[%s4726_s5] sm:$0xff]  ;;  %4838 = vst [vmem:[#allocation15_spill] sm:$0xff] %v3156_v25  ;;  %v3162_v29 = vsub.s32 3, %v3156_v25  ;;  %v3184_v49 = vsub.s32 0, %v3156_v25 }
  0x3f   :  { %2567 = vmatmul.mubr.msk.f32.vlgmr.msra.gmra.mrb[0].mxu0 %vm94_vm0, %v87_v7  ;;  %2568 = vmatmul.mubr.msk.f32.vlgmr.msra.gmra.mrb[0].mxu1 %vm94_vm0, %v87_v7  ;;  %v3164_v30 = vld [vmem:[#allocation8] ss:$8 sm:$0xf]  ;;  %vm250_vm1 = vcmp.lt.s32.totalorder %v3159_v27, 17  ;;  %vm293_vm2 = vcmp.lt.s32.totalorder %v3159_v27, 16  ;;  %v3187_v50 = vsub.s32 1, %v3156_v25 }
  0x40   :  { %91 = vperm.xlu0 %2830, %v88_v8   ;;  %738 = vmatprep.mubr.f32.mxu0 %v4735_v1  ;;  %4839 = vst [vmem:[#allocation16_spill] sm:$0xff] %v3162_v29  ;;  %v3167_v33 = vld [vmem:[#allocation8 + $0x1] ss:$8 sm:$0xf]  ;;  %v272_v34 = vrot.slane %v3164_v30, %v3162_v29  ;;  %4840 = vst [vmem:[#allocation17_spill] sm:$0xff] %v3184_v49  ;;  %v3190_v51 = vsub.s32 2, %v3156_v25  ;;  %v260_v55 = vrot.slane %v3164_v30, %v3184_v49 }
  0x41   :  { %827 = vmatprep.mubr.f32.mxu1 %v4735_v1  ;;  %v316_v35 = vrot.slane %v3167_v33, %v3162_v29  ;;  %4841 = vst [vmem:[#allocation18_spill] sm:$0xff] %v3187_v50  ;;  %v3194_v54 = vld [vmem:[#allocation8 + $0x2] ss:$8 sm:$0xf]  ;;  %v304_v56 = vrot.slane %v3167_v33, %v3184_v49  ;;  %v308_v58 = vrot.slane %v3167_v33, %v3187_v50  ;;  %vm337_vm3 = vcmp.lt.s32.totalorder %v3159_v27, 15 }
  0x42   :  { %4842 = vst [vmem:[#allocation19_spill] sm:$0xff] %v3190_v51  ;;  %v3200_v57 = vld [vmem:[#allocation8 + $0x3] ss:$8 sm:$0xf]  ;;  %v312_v59 = vrot.slane %v3167_v33, %v3190_v51  ;;  %v352_v63 = vrot.slane %v3194_v54, %v3187_v50  ;;  %v356_v0 = vrot.slane %v3194_v54, %v3190_v51  ;;  %v348_v2 = vrot.slane %v3194_v54, %v3184_v49 }
  0x43   :  { %v360_v3 = vrot.slane %v3194_v54, %v3162_v29  ;;  %v3217_v4 = vld [vmem:[#allocation8 + $0x5] ss:$8 sm:$0xf]  ;;  %vm381_vm4 = vcmp.lt.s32.totalorder %v3159_v27, 1  ;;  %v396_v6 = vrot.slane %v3200_v57, %v3187_v50  ;;  %v400_v7 = vrot.slane %v3200_v57, %v3190_v51 }
  0x44   :  { %vm429_vm5 = vcmp.lt.s32.totalorder %v3159_v27, 127  ;;  %v452_v33 = vrot.slane %v3217_v4, %v3162_v29  ;;  %vm473_vm6 = vcmp.lt.s32.totalorder %v3159_v27, 113  ;;  %vm517_vm7 = vcmp.lt.s32.totalorder %v3159_v27, 112 }
  0x45   :  { %vm561_vm8 = vcmp.lt.s32.totalorder %v3159_v27, 111  ;;  %v1718_v27 = vld [vmem:[%s4727_s6 + $0x10] sm:$0xff] }
  0xbf   :  { %v92_v9 = vpop.permute.xlu0 %91 }
 0x112   :  { %v164_v10 = vpop.f32.mrb[0].mxu0  ;;  %v235_v11 = vpop.f32.mrb[0].mxu1 }
 0x113   :  { %v3067_v12 = vadd.f32 %v164_v10, %v92_v9  ;;  %v3069_v13 = vadd.f32 %v235_v11, %v92_v9  ;;  %v166_v14 = vpop.f32.mrb[1].mxu0  ;;  %v237_v15 = vpop.f32.mrb[1].mxu1  ;;  %v404_v10 = vrot.slane %v3200_v57, %v3162_v29 }
 0x114   :  { %v3075_v16 = vadd.f32 %v237_v15, %v92_v9  ;;  %v3081_v17 = vadd.f32 %v166_v14, %v92_v9  ;;  %v392_v9 = vrot.slane %v3200_v57, %v3184_v49  ;;  %v440_v15 = vrot.slane %v3217_v4, %v3184_v49 }
 0x115   :  { %244 = vrot.lane.b32.xlu1 %v3069_v13, %s2943_s2  ;;  %240 = vrot.lane.b32.xlu0 %v3067_v12, %s2943_s2 }
 0x119   :  { %285 = vrot.lane.b32.xlu1 %v3067_v12, %s2944_s3  ;;  %246 = vrot.lane.b32.xlu0 %v3075_v16, %s2943_s2 }
 0x11d   :  { %289 = vrot.lane.b32.xlu1 %v3069_v13, %s2944_s3  ;;  %287 = vrot.lane.b32.xlu0 %v3081_v17, %s2944_s3 }
 0x121   :  { %329 = vrot.lane.b32.xlu1 %v3067_v12, %s2945_s27  ;;  %291 = vrot.lane.b32.xlu0 %v3075_v16, %s2944_s3 }
 0x125   :  { %333 = vrot.lane.b32.xlu1 %v3069_v13, %s2945_s27  ;;  %331 = vrot.lane.b32.xlu0 %v3081_v17, %s2945_s27 }
 0x129   :  { %373 = vrot.lane.b32.xlu1 %v3067_v12, %s2946_s28  ;;  %335 = vrot.lane.b32.xlu0 %v3075_v16, %s2945_s27 }
 0x12d   :  { %377 = vrot.lane.b32.xlu1 %v3069_v13, %s2946_s28  ;;  %375 = vrot.lane.b32.xlu0 %v3081_v17, %s2946_s28 }
 0x131   :  { %421 = vrot.lane.b32.xlu1 %v3067_v12, %s2947_s29  ;;  %379 = vrot.lane.b32.xlu0 %v3075_v16, %s2946_s28 }
 0x135   :  { %425 = vrot.lane.b32.xlu1 %v3069_v13, %s2947_s29  ;;  %423 = vrot.lane.b32.xlu0 %v3081_v17, %s2947_s29 }
 0x139   :  { %465 = vrot.lane.b32.xlu1 %v3067_v12, %s2948_s1  ;;  %427 = vrot.lane.b32.xlu0 %v3075_v16, %s2947_s29 }
 0x13d   :  { %242 = vrot.lane.b32.xlu1 %v3081_v17, %s2943_s2  ;;  %467 = vrot.lane.b32.xlu0 %v3081_v17, %s2948_s1 }
 0x141   :  { %469 = vrot.lane.b32.xlu1 %v3069_v13, %s2948_s1  ;;  %471 = vrot.lane.b32.xlu0 %v3075_v16, %s2948_s1 }
 0x145   :  { %509 = vrot.lane.b32.xlu1 %v3067_v12, %s2949_s24  ;;  %511 = vrot.lane.b32.xlu0 %v3081_v17, %s2949_s24 }
 0x149   :  { %513 = vrot.lane.b32.xlu1 %v3069_v13, %s2949_s24  ;;  %515 = vrot.lane.b32.xlu0 %v3075_v16, %s2949_s24 }
 0x14d   :  { %553 = vrot.lane.b32.xlu1 %v3067_v12, %s2950_s30  ;;  %555 = vrot.lane.b32.xlu0 %v3081_v17, %s2950_s30 }
 0x151   :  { %557 = vrot.lane.b32.xlu1 %v3069_v13, %s2950_s30  ;;  %559 = vrot.lane.b32.xlu0 %v3075_v16, %s2950_s30 }
 0x155   :  { %648 = vperm.xlu0 %2830, %v638_v18   ;;  %643 = vperm.xlu1 %2831, %v637_v20   ;;  %v444_v18 = vrot.slane %v3217_v4, %v3187_v50 }
 0x159   :  { %658 = vperm.xlu0 %2830, %v640_v19   ;;  %653 = vperm.xlu1 %2831, %v639_v21  }
 0x187   :  { %v3151_v23 = vpop.permute.xlu1 %244  ;;  %v3153_v24 = vpop.permute.xlu0 %240 }
 0x18b   :  { %v286_v26 = vpop.permute.xlu1 %285  ;;  %v247_v28 = vpop.permute.xlu0 %246 }
 0x18c   :  { %v251_v36 = vsel %vm250_vm1, %v3151_v23, %v247_v28  ;;  %v254_v5 = vsel %vm250_vm1, %v247_v28, %v3153_v24  ;;  %v448_v28 = vrot.slane %v3217_v4, %v3190_v51 }
 0x18d   :  { %v280_v40 = vmul.f32 %v272_v34, %v251_v36  ;;  %v277_v21 = vmul.f32 %v260_v55, %v254_v5 }
 0x18f   :  { %v290_v31 = vpop.permute.xlu1 %289  ;;  %v288_v32 = vpop.permute.xlu0 %287 }
 0x190   :  { %v295_v11 = vsel %vm293_vm2, %v288_v32, %v290_v31  ;;  %v296_v14 = vsel %vm293_vm2, %v286_v26, %v288_v32 }
 0x193   :  { %v3177_v37 = vpop.permute.xlu1 %329  ;;  %v292_v38 = vpop.permute.xlu0 %291 }
 0x194   :  { %v294_v39 = vsel %vm293_vm2, %v290_v31, %v292_v38  ;;  %v297_v60 = vsel %vm293_vm2, %v292_v38, %v286_v26  ;;  %v264_v31 = vrot.slane %v3164_v30, %v3187_v50  ;;  %v3248_v26 = vld [vmem:[#allocation8 + $0x6] ss:$8 sm:$0xf]  ;;  %v322_v38 = vmul.f32 %v308_v58, %v296_v14 }
 0x195   :  { %v324_v41 = vmul.f32 %v316_v35, %v294_v39  ;;  %v321_v8 = vmul.f32 %v304_v56, %v297_v60  ;;  %v268_v35 = vrot.slane %v3164_v30, %v3190_v51  ;;  %v488_v36 = vrot.slane %v3248_v26, %v3187_v50 }
 0x196   :  { %v323_v39 = vmul.f32 %v312_v59, %v295_v11 }
 0x197   :  { %v334_v42 = vpop.permute.xlu1 %333  ;;  %v332_v43 = vpop.permute.xlu0 %331  ;;  %v2603_v44 = vpack.c.bf16 %v324_v41, %v280_v40  ;;  %v2589_v40 = vpack.c.bf16 %v321_v8, %v277_v21  ;;  %v492_v41 = vrot.slane %v3248_v26, %v3190_v51 }
 0x198   :  { %v340_v55 = vsel %vm337_vm3, %v3177_v37, %v332_v43 }
 0x199   :  { %2604 = vmatprep.subr.bf16.mxu1 %v2603_v44  ;;  %v339_v44 = vsel %vm337_vm3, %v332_v43, %v334_v42  ;;  %v366_v8 = vmul.f32 %v352_v63, %v340_v55 }
 0x19b   :  { %v374_v45 = vpop.permute.xlu1 %373  ;;  %v3181_v46 = vpop.permute.xlu0 %335 }
 0x19c   :  { %v338_v30 = vsel %vm337_vm3, %v334_v42, %v3181_v46 }
 0x19f   :  { %v378_v47 = vpop.permute.xlu1 %377  ;;  %v376_v48 = vpop.permute.xlu0 %375 }
 0x1a0   :  { %v384_v32 = vsel %vm381_vm4, %v374_v45, %v376_v48  ;;  %v383_v56 = vsel %vm381_vm4, %v376_v48, %v378_v47 }
 0x1a1   :  { %v410_v59 = vmul.f32 %v396_v6, %v384_v32  ;;  %v341_v6 = vsel %vm337_vm3, %v3181_v46, %v3177_v37  ;;  %v523_v37 = vld [vmem:[#allocation8 + $0x7] ss:$8 sm:$0xf]  ;;  %v367_v46 = vmul.f32 %v356_v0, %v339_v44 }
 0x1a2   :  { %v540_v44 = vrot.slane %v523_v37, %v3162_v29 }
 0x1a3   :  { %v3192_v52 = vpop.permute.xlu1 %421  ;;  %v380_v53 = vpop.permute.xlu0 %379 }
 0x1a4   :  { %v382_v34 = vsel %vm381_vm4, %v378_v47, %v380_v53  ;;  %v385_v43 = vsel %vm381_vm4, %v380_v53, %v374_v45 }
 0x1a5   :  { %v412_v60 = vmul.f32 %v404_v10, %v382_v34 }
 0x1a7   :  { %v426_v61 = vpop.permute.xlu1 %425  ;;  %v424_v62 = vpop.permute.xlu0 %423 }
 0x1a8   :  { %v431_v10 = vsel %vm429_vm5, %v424_v62, %v426_v61  ;;  %v432_v45 = vsel %vm429_vm5, %v3192_v52, %v424_v62 }
 0x1a9   :  { %v457_v62 = vmul.f32 %v440_v15, %v432_v45 }
 0x1ab   :  { %v3240_v19 = vpop.permute.xlu1 %465  ;;  %v428_v20 = vpop.permute.xlu0 %427  ;;  %v2597_v55 = vpack.c.bf16 %v457_v62, %v3067_v12  ;;  %v598_v62 = vld [vmem:[#allocation10 + $0x8] sm:$0xff] }
 0x1ac   :  { %v433_v42 = vsel %vm429_vm5, %v428_v20, %v3192_v52  ;;  %v430_v63 = vsel %vm429_vm5, %v426_v61, %v428_v20  ;;  %v365_v52 = vmul.f32 %v348_v2, %v341_v6  ;;  %v528_v20 = vrot.slane %v523_v37, %v3184_v49 }
 0x1ad   :  { %v460_v32 = vmul.f32 %v452_v33, %v433_v42  ;;  %v459_v0 = vmul.f32 %v448_v28, %v430_v63 }
 0x1af   :  { %v243_v57 = vpop.permute.xlu1 %242  ;;  %v468_v58 = vpop.permute.xlu0 %467  ;;  %v2611_v15 = vpack.c.bf16 %v460_v32, %v3075_v16  ;;  %v2613_v16 = vpack.c.bf16 %v459_v0, %v3069_v13 }
 0x1b0   :  { %v252_v4 = vsel %vm250_vm1, %v243_v57, %v3151_v23  ;;  %v253_v5 = vsel %vm250_vm1, %v3153_v24, %v243_v57  ;;  %v368_v23 = vmul.f32 %v360_v3, %v338_v30  ;;  %v411_v24 = vmul.f32 %v400_v7, %v383_v56 }
 0x1b1   :  { %v278_v47 = vmul.f32 %v264_v31, %v253_v5  ;;  %v279_v48 = vmul.f32 %v268_v35, %v252_v4  ;;  %v409_v31 = vmul.f32 %v392_v9, %v385_v43  ;;  %v458_v3 = vmul.f32 %v444_v18, %v431_v10 }
 0x1b2   :  { %v2607_v34 = vpack.c.bf16 %v412_v60, %v368_v23  ;;  %v2591_v7 = vpack.c.bf16 %v410_v59, %v366_v8  ;;  %v496_v9 = vrot.slane %v3248_v26, %v3162_v29  ;;  %v2609_v61 = vpack.c.bf16 %v411_v24, %v367_v46 }
 0x1b3   :  { %v2605_v53 = vpack.c.bf16 %v323_v39, %v279_v48  ;;  %v470_v11 = vpop.permute.xlu1 %469  ;;  %v472_v14 = vpop.permute.xlu0 %471  ;;  %v2587_v21 = vpack.c.bf16 %v322_v38, %v278_v47  ;;  %v532_v35 = vrot.slane %v523_v37, %v3187_v50  ;;  %v2593_v38 = vpack.c.bf16 %v409_v31, %v365_v52  ;;  %v567_v48 = vld [vmem:[#allocation8 + $0x20] ss:$8 sm:$0xf] }
 0x1b4   :  { %v475_v54 = vsel %vm473_vm6, %v468_v58, %v470_v11  ;;  %v474_v2 = vsel %vm473_vm6, %v470_v11, %v472_v14  ;;  %v2595_v28 = vpack.c.bf16 %v458_v3, %v3081_v17  ;;  %v484_v30 = vrot.slane %v3248_v26, %v3184_v49  ;;  %v597_v52 = vld [vmem:[#allocation10] sm:$0xff] }
 0x1b5   :  { %2588 = vmatprep.subr.bf16.mxu0 %v2587_v21  ;;  %2606 = vmatpush1.bf16.msra.mxu1 %v2605_v53  ;;  %v477_v56 = vsel %vm473_vm6, %v472_v14, %v3240_v19  ;;  %v476_v17 = vsel %vm473_vm6, %v3240_v19, %v468_v58  ;;  %v502_v57 = vmul.f32 %v488_v36, %v475_v54 }
 0x1b6   :  { %2590 = vmatpush1.bf16.msra.mxu0 %v2589_v40  ;;  %2608 = vmatprep.subr.bf16.mxu1 %v2607_v34  ;;  %v536_v40 = vrot.slane %v523_v37, %v3190_v51  ;;  %v503_v12 = vmul.f32 %v492_v41, %v474_v2  ;;  %v504_v58 = vmul.f32 %v496_v9, %v477_v56  ;;  %v599_v9 = vld [vmem:[#allocation10 + $0x10] sm:$0xff] }
 0x1b7   :  { %v510_v18 = vpop.permute.xlu1 %509  ;;  %2592 = vmatprep.subr.bf16.mxu0 %v2591_v7  ;;  %v512_v33 = vpop.permute.xlu0 %511  ;;  %v501_v26 = vmul.f32 %v484_v30, %v476_v17  ;;  %v580_v24 = vrot.slane %v567_v48, %v3190_v51  ;;  %v576_v45 = vrot.slane %v567_v48, %v3187_v50  ;;  %v584_v53 = vrot.slane %v567_v48, %v3162_v29 }
 0x1b8   :  { %v520_v39 = vsel %vm517_vm7, %v510_v18, %v512_v33  ;;  %v572_v11 = vrot.slane %v567_v48, %v3184_v49 }
 0x1b9   :  { %2610 = vmatpush1.bf16.msra.mxu1 %v2609_v61  ;;  %v545_v4 = vmul.f32 %v528_v20, %v520_v39  ;;  %v600_v61 = vld [vmem:[#allocation10 + $0x18] sm:$0xff] }
 0x1ba   :  { %2594 = vmatpush1.bf16.msra.mxu0 %v2593_v38  ;;  %2612 = vmatprep.subr.bf16.mxu1 %v2611_v15 }
 0x1bb   :  { %v514_v59 = vpop.permute.xlu1 %513  ;;  %2596 = vmatprep.subr.bf16.mxu0 %v2595_v28  ;;  %v516_v60 = vpop.permute.xlu0 %515  ;;  %v2601_v10 = vpack.c.bf16 %v545_v4, %v501_v26 }
 0x1bc   :  { %v519_v5 = vsel %vm517_vm7, %v512_v33, %v514_v59  ;;  %v518_v13 = vsel %vm517_vm7, %v514_v59, %v516_v60  ;;  %v521_v19 = vsel %vm517_vm7, %v516_v60, %v510_v18 }
 0x1bd   :  { %v546_v43 = vmul.f32 %v532_v35, %v519_v5  ;;  %v547_v36 = vmul.f32 %v536_v40, %v518_v13  ;;  %v548_v42 = vmul.f32 %v540_v44, %v521_v19  ;;  %2614 = vmatpush1.bf16.msra.mxu1 %v2613_v16 }
 0x1be   :  { %2598 = vmatpush1.bf16.msra.mxu0 %v2597_v55 }
 0x1bf   :  { %v2617_v41 = vpack.c.bf16 %v547_v36, %v503_v12  ;;  %v554_v47 = vpop.permute.xlu1 %553  ;;  %v556_v8 = vpop.permute.xlu0 %555  ;;  %v2599_v6 = vpack.c.bf16 %v546_v43, %v502_v57  ;;  %v2615_v23 = vpack.c.bf16 %v548_v42, %v504_v58 }
 0x1c0   :  { %v564_v14 = vsel %vm561_vm8, %v554_v47, %v556_v8 }
 0x1c1   :  { %2600 = vmatprep.subr.bf16.mxu0 %v2599_v6  ;;  %2616 = vmatprep.subr.bf16.mxu1 %v2615_v23  ;;  %v589_v7 = vmul.f32 %v572_v11, %v564_v14 }
 0x1c2   :  { %2602 = vmatpush1.bf16.msra.mxu0 %v2601_v10  ;;  %2618 = vmatpush1.bf16.msra.mxu1 %v2617_v41 }
 0x1c3   :  { %v558_v21 = vpop.permute.xlu1 %557  ;;  %v560_v31 = vpop.permute.xlu0 %559 }
 0x1c4   :  { %v563_v63 = vsel %vm561_vm8, %v556_v8, %v558_v21  ;;  %v562_v32 = vsel %vm561_vm8, %v558_v21, %v560_v31  ;;  %v565_v34 = vsel %vm561_vm8, %v560_v31, %v554_v47 }
 0x1c5   :  { %v591_v37 = vmul.f32 %v580_v24, %v562_v32  ;;  %v590_v46 = vmul.f32 %v576_v45, %v563_v63  ;;  %v592_v3 = vmul.f32 %v584_v53, %v565_v34 }
 0x1c7   :  { %690 = vmatprep.subr.mxu0 %v590_v46  ;;  %779 = vmatprep.subr.mxu1 %v592_v3 }
 0x1c8   :  { %691 = vmatpush1.msra.mxu0 %v589_v7  ;;  %780 = vmatpush1.msra.mxu1 %v591_v37 }
 0x1c9   :  { %2569 = vmatmul.mubr.msk.f32.vlgmr.msra.gmra.mrb[2].mxu0 %vm661_vm9, %v597_v52  ;;  %2573 = vmatmul.mubr.msk.f32.vlgmr.msra.gmra.mrb[2].mxu1 %vm661_vm9, %v597_v52 }
 0x1ca   :  { %744 = vmatprep.mubr.f32.mxu0 %v4735_v1  ;;  %833 = vmatprep.mubr.f32.mxu1 %v4735_v1 }
 0x1cd   :  { %2570 = vmatmul.mubr.msk.f32.gmra.mrb[4].mxu0 %vm661_vm9, %v598_v62  ;;  %2574 = vmatmul.mubr.msk.f32.gmra.mrb[4].mxu1 %vm661_vm9, %v598_v62 }
 0x1ce   :  { %750 = vmatprep.mubr.f32.mxu0 %v4735_v1  ;;  %839 = vmatprep.mubr.f32.mxu1 %v4735_v1 }
 0x1d1   :  { %2571 = vmatmul.mubr.msk.f32.gmra.mrb[6].mxu0 %vm661_vm9, %v599_v9  ;;  %2575 = vmatmul.mubr.msk.f32.gmra.mrb[6].mxu1 %vm661_vm9, %v599_v9 }
 0x1d2   :  { %756 = vmatprep.mubr.f32.mxu0 %v4735_v1  ;;  %845 = vmatprep.mubr.f32.mxu1 %v4735_v1 }
 0x1d4   :  { %v644_v0 = vpop.permute.xlu1 %643  ;;  %v649_v2 = vpop.permute.xlu0 %648 }
 0x1d5   :  { %2572 = vmatmul.mubr.msk.f32.gmra.mrb[8].mxu0 %vm661_vm9, %v600_v61  ;;  %2576 = vmatmul.mubr.msk.f32.gmra.mrb[8].mxu1 %vm661_vm9, %v600_v61 }
 0x1d8   :  { %v3504_v21 = vpop.permute.xlu1 %653  ;;  %v3512_v63 = vpop.permute.xlu0 %658 }
 0x29c   :  { %v740_v18 = vpop.f32.mrb[2].mxu0  ;;  %v829_v20 = vpop.f32.mrb[2].mxu1 }
 0x29d   :  { %v741_v33 = vadd.f32 %v740_v18, %v644_v0  ;;  %v742_v35 = vpop.f32.mrb[3].mxu0  ;;  %v830_v38 = vadd.f32 %v829_v20, %v644_v0  ;;  %v831_v54 = vpop.f32.mrb[3].mxu1 }
 0x29e   :  { %v743_v41 = vadd.f32 %v742_v35, %v644_v0  ;;  %v832_v48 = vadd.f32 %v831_v54, %v644_v0 }
 0x29f   :  { %v852_v15 = vmul.f32 0.01, %v741_v33  ;;  %v854_v44 = vmul.f32 0.01, %v830_v38 }
 0x2a0   :  { %v746_v39 = vpop.f32.mrb[4].mxu0  ;;  %v835_v28 = vpop.f32.mrb[4].mxu1  ;;  %v853_v47 = vmul.f32 0.01, %v743_v41  ;;  %v855_v23 = vmul.f32 0.01, %v832_v48 }
 0x2a1   :  { %v3360_v40 = vmax.f32 %v741_v33, %v852_v15  ;;  %v747_v55 = vadd.f32 %v746_v39, %v649_v2  ;;  %v836_v30 = vadd.f32 %v835_v28, %v649_v2  ;;  %v748_v56 = vpop.f32.mrb[5].mxu0  ;;  %v837_v16 = vpop.f32.mrb[5].mxu1  ;;  %v3368_v59 = vmax.f32 %v830_v38, %v854_v44 }
 0x2a2   :  { %v749_v8 = vadd.f32 %v748_v56, %v649_v2  ;;  %v3444_v6 = vmax.f32 %v743_v41, %v853_v47  ;;  %v838_v24 = vadd.f32 %v837_v16, %v649_v2  ;;  %v3450_v45 = vmax.f32 %v832_v48, %v855_v23 }
 0x2a3   :  { %4843 = vst [vmem:[#allocation20_spill] sm:$0xff] %v3360_v40  ;;  %v856_v17 = vmul.f32 0.01, %v747_v55  ;;  %884 = vrot.lane.b32.xlu1 %v3360_v40, %s2943_s2  ;;  %4844 = vst [vmem:[#allocation21_spill] sm:$0xff] %v3368_v59  ;;  %v858_v4 = vmul.f32 0.01, %v836_v30 }
 0x2a4   :  { %v3364_v57 = vpop.f32.mrb[6].mxu0  ;;  %v3366_v12 = vpop.f32.mrb[6].mxu1  ;;  %4846 = vst [vmem:[#allocation23_spill] sm:$0xff] %v3444_v6  ;;  %v857_v10 = vmul.f32 0.01, %v749_v8 }
 0x2a5   :  { %v3370_v60 = vmax.f32 %v747_v55, %v856_v17  ;;  %v3372_v5 = vpop.f32.mrb[7].mxu0  ;;  %v3374_v13 = vpop.f32.mrb[7].mxu1  ;;  %v3386_v36 = vmax.f32 %v836_v30, %v858_v4  ;;  %v859_v11 = vmul.f32 0.01, %v838_v24  ;;  %v753_v31 = vadd.f32 %v3364_v57, %v3504_v21 }
 0x2a6   :  { %v3452_v53 = vmax.f32 %v749_v8, %v857_v10  ;;  %v842_v34 = vadd.f32 %v3366_v12, %v3504_v21  ;;  %v755_v23 = vadd.f32 %v3372_v5, %v3504_v21 }
 0x2a7   :  { %4845 = vst [vmem:[#allocation22_spill] sm:$0xff] %v3370_v60  ;;  %900 = vrot.lane.b32.xlu1 %v3368_v59, %s2943_s2  ;;  %886 = vrot.lane.b32.xlu0 %v3370_v60, %s2943_s2  ;;  %v3458_v14 = vmax.f32 %v838_v24, %v859_v11  ;;  %v860_v32 = vmul.f32 0.01, %v753_v31 }
 0x2a8   :  { %v3382_v58 = vpop.f32.mrb[8].mxu0  ;;  %v3384_v43 = vpop.f32.mrb[8].mxu1  ;;  %4847 = vst [vmem:[#allocation24_spill] sm:$0xff] %v3452_v53  ;;  %v862_v7 = vmul.f32 0.01, %v842_v34 }
 0x2a9   :  { %v3388_v42 = vpop.f32.mrb[9].mxu0  ;;  %v3390_v26 = vpop.f32.mrb[9].mxu1  ;;  %v759_v37 = vadd.f32 %v3382_v58, %v3512_v63  ;;  %v3524_v3 = vmax.f32 %v753_v31, %v860_v32  ;;  %v848_v62 = vadd.f32 %v3384_v43, %v3512_v63  ;;  %v861_v11 = vmul.f32 0.01, %v755_v23 }
 0x2aa   :  { %v3536_v0 = vmax.f32 %v842_v34, %v862_v7  ;;  %v844_v31 = vadd.f32 %v3374_v13, %v3504_v21  ;;  %v761_v5 = vadd.f32 %v3388_v42, %v3512_v63  ;;  %v850_v13 = vadd.f32 %v3390_v26, %v3512_v63 }
 0x2ab   :  { %986 = vrot.lane.b32.xlu1 %v3360_v40, %s2944_s3  ;;  %902 = vrot.lane.b32.xlu0 %v3386_v36, %s2943_s2  ;;  %4848 = vst [vmem:[#allocation25_spill] sm:$0xff] %v3524_v3  ;;  %v864_v52 = vmul.f32 0.01, %v759_v37  ;;  %v866_v20 = vmul.f32 0.01, %v848_v62  ;;  %v3652_v7 = vmax.f32 %v755_v23, %v861_v11 }
 0x2ac   :  { %4849 = vst [vmem:[#allocation26_spill] sm:$0xff] %v3536_v0  ;;  %v867_v26 = vmul.f32 0.01, %v850_v13 }
 0x2ad   :  { %v3538_v18 = vmax.f32 %v759_v37, %v864_v52  ;;  %v3548_v38 = vmax.f32 %v848_v62, %v866_v20  ;;  %v932_v37 = vld [vmem:[#allocation8] ss:$8 sm:$0xf]  ;;  %v863_v52 = vmul.f32 0.01, %v844_v31 }
 0x2ae   :  { %v865_v20 = vmul.f32 0.01, %v761_v5  ;;  %v3659_v22 = vrot.slane %v932_v37, %v3187_v50 }
 0x2af   :  { %1002 = vrot.lane.b32.xlu1 %v3368_v59, %s2944_s3  ;;  %988 = vrot.lane.b32.xlu0 %v3370_v60, %s2944_s3  ;;  %4850 = vst [vmem:[#allocation27_spill] sm:$0xff] %v3538_v18  ;;  %4851 = vst [vmem:[#allocation28_spill] sm:$0xff] %v3548_v38  ;;  %v3668_v23 = vmax.f32 %v844_v31, %v863_v52 }
 0x2b0   :  { %v3670_v1 = vmax.f32 %v761_v5, %v865_v20  ;;  %v3693_v20 = vmax.f32 %v850_v13, %v867_v26 }
 0x2b3   :  { %1088 = vrot.lane.b32.xlu1 %v3360_v40, %s2945_s27  ;;  %1004 = vrot.lane.b32.xlu0 %v3386_v36, %s2944_s3 }
 0x2b7   :  { %1104 = vrot.lane.b32.xlu1 %v3368_v59, %s2945_s27  ;;  %1090 = vrot.lane.b32.xlu0 %v3370_v60, %s2945_s27 }
 0x2bb   :  { %1190 = vrot.lane.b32.xlu1 %v3360_v40, %s2946_s28  ;;  %1106 = vrot.lane.b32.xlu0 %v3386_v36, %s2945_s27 }
 0x2bf   :  { %1206 = vrot.lane.b32.xlu1 %v3368_v59, %s2946_s28  ;;  %1192 = vrot.lane.b32.xlu0 %v3370_v60, %s2946_s28 }
 0x2c3   :  { %1308 = vrot.lane.b32.xlu1 %v3360_v40, %s2947_s29  ;;  %1208 = vrot.lane.b32.xlu0 %v3386_v36, %s2946_s28 }
 0x2c7   :  { %1324 = vrot.lane.b32.xlu1 %v3368_v59, %s2947_s29  ;;  %1310 = vrot.lane.b32.xlu0 %v3370_v60, %s2947_s29 }
 0x2cb   :  { %1410 = vrot.lane.b32.xlu1 %v3360_v40, %s2948_s1  ;;  %1326 = vrot.lane.b32.xlu0 %v3386_v36, %s2947_s29 }
 0x2cf   :  { %1426 = vrot.lane.b32.xlu1 %v3368_v59, %s2948_s1  ;;  %1412 = vrot.lane.b32.xlu0 %v3370_v60, %s2948_s1 }
 0x2d3   :  { %1512 = vrot.lane.b32.xlu1 %v3360_v40, %s2949_s24  ;;  %1428 = vrot.lane.b32.xlu0 %v3386_v36, %s2948_s1 }
 0x2d7   :  { %1528 = vrot.lane.b32.xlu1 %v3368_v59, %s2949_s24  ;;  %1514 = vrot.lane.b32.xlu0 %v3370_v60, %s2949_s24 }
 0x2db   :  { %1614 = vrot.lane.b32.xlu1 %v3360_v40, %s2950_s30  ;;  %1530 = vrot.lane.b32.xlu0 %v3386_v36, %s2949_s24 }
 0x2df   :  { %892 = vrot.lane.b32.xlu1 %v3444_v6, %s2943_s2  ;;  %1616 = vrot.lane.b32.xlu0 %v3370_v60, %s2950_s30 }
 0x2e3   :  { %908 = vrot.lane.b32.xlu1 %v3450_v45, %s2943_s2  ;;  %894 = vrot.lane.b32.xlu0 %v3452_v53, %s2943_s2 }
 0x2e7   :  { %994 = vrot.lane.b32.xlu1 %v3444_v6, %s2944_s3  ;;  %910 = vrot.lane.b32.xlu0 %v3458_v14, %s2943_s2 }
 0x2eb   :  { %1010 = vrot.lane.b32.xlu1 %v3450_v45, %s2944_s3  ;;  %996 = vrot.lane.b32.xlu0 %v3452_v53, %s2944_s3 }
 0x2ef   :  { %1096 = vrot.lane.b32.xlu1 %v3444_v6, %s2945_s27  ;;  %1012 = vrot.lane.b32.xlu0 %v3458_v14, %s2944_s3 }
 0x2f3   :  { %1112 = vrot.lane.b32.xlu1 %v3450_v45, %s2945_s27  ;;  %1098 = vrot.lane.b32.xlu0 %v3452_v53, %s2945_s27 }
 0x2f7   :  { %1198 = vrot.lane.b32.xlu1 %v3444_v6, %s2946_s28  ;;  %1114 = vrot.lane.b32.xlu0 %v3458_v14, %s2945_s27 }
 0x2fb   :  { %1214 = vrot.lane.b32.xlu1 %v3450_v45, %s2946_s28  ;;  %1200 = vrot.lane.b32.xlu0 %v3452_v53, %s2946_s28 }
 0x2ff   :  { %1316 = vrot.lane.b32.xlu1 %v3444_v6, %s2947_s29  ;;  %1216 = vrot.lane.b32.xlu0 %v3458_v14, %s2946_s28 }
 0x303   :  { %1332 = vrot.lane.b32.xlu1 %v3450_v45, %s2947_s29  ;;  %1318 = vrot.lane.b32.xlu0 %v3452_v53, %s2947_s29 }
 0x307   :  { %1418 = vrot.lane.b32.xlu1 %v3444_v6, %s2948_s1  ;;  %1334 = vrot.lane.b32.xlu0 %v3458_v14, %s2947_s29 }
 0x30b   :  { %1434 = vrot.lane.b32.xlu1 %v3450_v45, %s2948_s1  ;;  %1420 = vrot.lane.b32.xlu0 %v3452_v53, %s2948_s1 }
 0x30f   :  { %1520 = vrot.lane.b32.xlu1 %v3444_v6, %s2949_s24  ;;  %1436 = vrot.lane.b32.xlu0 %v3458_v14, %s2948_s1 }
 0x313   :  { %1536 = vrot.lane.b32.xlu1 %v3450_v45, %s2949_s24  ;;  %1522 = vrot.lane.b32.xlu0 %v3452_v53, %s2949_s24 }
 0x315   :  { %v3518_v46 = vpop.permute.xlu1 %884 }
 0x317   :  { %1622 = vrot.lane.b32.xlu1 %v3444_v6, %s2950_s30  ;;  %1538 = vrot.lane.b32.xlu0 %v3458_v14, %s2949_s24  ;;  %v1238_v6 = vld [vmem:[#allocation8 + $0x3] ss:$8 sm:$0xf] }
 0x319   :  { %v3528_v9 = vpop.permute.xlu1 %900  ;;  %v3530_v61 = vpop.permute.xlu0 %886 }
 0x31b   :  { %888 = vrot.lane.b32.xlu1 %v3524_v3, %s2943_s2  ;;  %1624 = vrot.lane.b32.xlu0 %v3452_v53, %s2950_s30  ;;  %v3701_v53 = vrot.slane %v932_v37, %v3190_v51 }
 0x31d   :  { %v3540_v33 = vpop.permute.xlu1 %986  ;;  %v3542_v35 = vpop.permute.xlu0 %902 }
 0x31f   :  { %904 = vrot.lane.b32.xlu1 %v3536_v0, %s2943_s2  ;;  %890 = vrot.lane.b32.xlu0 %v3538_v18, %s2943_s2 }
 0x321   :  { %v3550_v54 = vpop.permute.xlu1 %1002  ;;  %v3552_v2 = vpop.permute.xlu0 %988 }
 0x323   :  { %990 = vrot.lane.b32.xlu1 %v3524_v3, %s2944_s3  ;;  %906 = vrot.lane.b32.xlu0 %v3548_v38, %s2943_s2 }
 0x325   :  { %v3558_v15 = vpop.permute.xlu1 %1088  ;;  %v3560_v39 = vpop.permute.xlu0 %1004 }
 0x327   :  { %1006 = vrot.lane.b32.xlu1 %v3536_v0, %s2944_s3  ;;  %992 = vrot.lane.b32.xlu0 %v3538_v18, %s2944_s3 }
 0x329   :  { %v3566_v28 = vpop.permute.xlu1 %1104  ;;  %v3568_v44 = vpop.permute.xlu0 %1090 }
 0x32b   :  { %1092 = vrot.lane.b32.xlu1 %v3524_v3, %s2945_s27  ;;  %1008 = vrot.lane.b32.xlu0 %v3548_v38, %s2944_s3 }
 0x32d   :  { %v3574_v55 = vpop.permute.xlu1 %1190  ;;  %v3576_v30 = vpop.permute.xlu0 %1106 }
 0x32f   :  { %1108 = vrot.lane.b32.xlu1 %v3536_v0, %s2945_s27  ;;  %1094 = vrot.lane.b32.xlu0 %v3538_v18, %s2945_s27 }
 0x331   :  { %v3582_v56 = vpop.permute.xlu1 %1206  ;;  %v3584_v16 = vpop.permute.xlu0 %1192 }
 0x333   :  { %1194 = vrot.lane.b32.xlu1 %v3524_v3, %s2946_s28  ;;  %1110 = vrot.lane.b32.xlu0 %v3548_v38, %s2945_s27 }
 0x335   :  { %v3590_v17 = vpop.permute.xlu1 %1308  ;;  %v3592_v57 = vpop.permute.xlu0 %1208 }
 0x337   :  { %1210 = vrot.lane.b32.xlu1 %v3536_v0, %s2946_s28  ;;  %1196 = vrot.lane.b32.xlu0 %v3538_v18, %s2946_s28 }
 0x339   :  { %v3598_v12 = vpop.permute.xlu1 %1324  ;;  %v3600_v4 = vpop.permute.xlu0 %1310 }
 0x33b   :  { %1312 = vrot.lane.b32.xlu1 %v3524_v3, %s2947_s29  ;;  %1212 = vrot.lane.b32.xlu0 %v3548_v38, %s2946_s28 }
 0x33d   :  { %v3606_v58 = vpop.permute.xlu1 %1410  ;;  %v3608_v43 = vpop.permute.xlu0 %1326 }
 0x33f   :  { %1328 = vrot.lane.b32.xlu1 %v3536_v0, %s2947_s29  ;;  %1314 = vrot.lane.b32.xlu0 %v3538_v18, %s2947_s29 }
 0x341   :  { %v3614_v41 = vpop.permute.xlu1 %1426  ;;  %v3616_v47 = vpop.permute.xlu0 %1412 }
 0x343   :  { %1414 = vrot.lane.b32.xlu1 %v3524_v3, %s2948_s1  ;;  %1330 = vrot.lane.b32.xlu0 %v3548_v38, %s2947_s29 }
 0x345   :  { %v3622_v48 = vpop.permute.xlu1 %1512  ;;  %v3624_v8 = vpop.permute.xlu0 %1428 }
 0x347   :  { %1430 = vrot.lane.b32.xlu1 %v3536_v0, %s2948_s1  ;;  %1416 = vrot.lane.b32.xlu0 %v3538_v18, %s2948_s1 }
 0x349   :  { %v3632_v10 = vpop.permute.xlu1 %1528  ;;  %v3634_v24 = vpop.permute.xlu0 %1514 }
 0x34b   :  { %1516 = vrot.lane.b32.xlu1 %v3524_v3, %s2949_s24  ;;  %1432 = vrot.lane.b32.xlu0 %v3548_v38, %s2948_s1 }
 0x34d   :  { %v3642_v32 = vpop.permute.xlu1 %1614  ;;  %v3644_v34 = vpop.permute.xlu0 %1530 }
 0x34e   :  { %4852 = vst [vmem:[#allocation29_spill] sm:$0xff] %v3642_v32  ;;  %v3680_v32 = vrot.slane %v932_v37, %v3162_v29 }
 0x34f   :  { %1532 = vrot.lane.b32.xlu1 %v3536_v0, %s2949_s24  ;;  %1518 = vrot.lane.b32.xlu0 %v3538_v18, %s2949_s24 }
 0x351   :  { %v893_v21 = vpop.permute.xlu1 %892  ;;  %v3656_v62 = vpop.permute.xlu0 %1616 }
 0x352   :  { %4853 = vst [vmem:[#allocation30_spill] sm:$0xff] %v3656_v62  ;;  %v924_v42 = vsel %vm250_vm1, %v3518_v46, %v893_v21  ;;  %v3677_v62 = vrot.slane %v932_v37, %v3184_v49 }
 0x353   :  { %896 = vrot.lane.b32.xlu1 %v3652_v7, %s2943_s2  ;;  %1534 = vrot.lane.b32.xlu0 %v3548_v38, %s2949_s24  ;;  %v955_v25 = vmul.f32 %v3659_v22, %v924_v42 }
 0x355   :  { %v909_v63 = vpop.permute.xlu1 %908  ;;  %v895_v11 = vpop.permute.xlu0 %894 }
 0x356   :  { %v925_v19 = vsel %vm250_vm1, %v3530_v61, %v895_v11  ;;  %v916_v5 = vsel %vm250_vm1, %v3528_v9, %v909_v63  ;;  %v928_v52 = vsel %vm250_vm1, %v909_v63, %v3518_v46  ;;  %v920_v46 = vsel %vm250_vm1, %v893_v21, %v3528_v9 }
 0x357   :  { %v959_v31 = vmul.f32 %v3659_v22, %v925_v19  ;;  %912 = vrot.lane.b32.xlu1 %v3668_v23, %s2943_s2  ;;  %898 = vrot.lane.b32.xlu0 %v3670_v1, %s2943_s2  ;;  %v921_v19 = vsel %vm250_vm1, %v895_v11, %v3542_v35  ;;  %v954_v63 = vmul.f32 %v3677_v62, %v928_v52  ;;  %v1136_v52 = vld [vmem:[#allocation8 + $0x2] ss:$8 sm:$0xf] }
 0x358   :  { %v957_v11 = vmul.f32 %v3680_v32, %v916_v5  ;;  %v960_v9 = vmul.f32 %v3701_v53, %v921_v19 }
 0x359   :  { %v3698_v42 = vpop.permute.xlu1 %994  ;;  %v911_v40 = vpop.permute.xlu0 %910  ;;  %v2619_v60 = vpack.c.bf16 %v959_v31, %v955_v25  ;;  %v956_v31 = vmul.f32 %v3701_v53, %v920_v46 }
 0x35a   :  { %v917_v13 = vsel %vm250_vm1, %v3542_v35, %v911_v40  ;;  %v929_v26 = vsel %vm250_vm1, %v911_v40, %v3530_v61 }
 0x35b   :  { %v958_v25 = vmul.f32 %v3677_v62, %v929_v26  ;;  %v961_v37 = vmul.f32 %v3680_v32, %v917_v13  ;;  %998 = vrot.lane.b32.xlu1 %v3652_v7, %s2944_s3  ;;  %914 = vrot.lane.b32.xlu0 %v3693_v20, %s2943_s2  ;;  %v2693_v5 = vpack.c.bf16 %v960_v9, %v956_v31 }
 0x35c   :  { %2620 = vmatprep.subr.bf16.mxu0 %v2619_v60  ;;  %v3733_v13 = vrot.slane %v1136_v52, %v3187_v50  ;;  %v3736_v26 = vrot.slane %v1136_v52, %v3190_v51  ;;  %v3752_v9 = vrot.slane %v1136_v52, %v3162_v29 }
 0x35d   :  { %v2621_v35 = vpack.c.bf16 %v958_v25, %v954_v63  ;;  %v3721_v21 = vpop.permute.xlu1 %1010  ;;  %v3723_v40 = vpop.permute.xlu0 %996  ;;  %v2691_v61 = vpack.c.bf16 %v961_v37, %v957_v11  ;;  %v3749_v37 = vrot.slane %v1136_v52, %v3184_v49 }
 0x35e   :  { %4854 = vst [vmem:[#allocation31_spill] sm:$0xff] %v3733_v13  ;;  %4855 = vst [vmem:[#allocation32_spill] sm:$0xff] %v3736_v26 }
 0x35f   :  { %1014 = vrot.lane.b32.xlu1 %v3668_v23, %s2944_s3  ;;  %1000 = vrot.lane.b32.xlu0 %v3670_v1, %s2944_s3  ;;  %4856 = vst [vmem:[#allocation33_spill] sm:$0xff] %v3749_v37  ;;  %4857 = vst [vmem:[#allocation34_spill] sm:$0xff] %v3752_v9 }
 0x360   :  { %2622 = vmatpush1.bf16.msra.mxu0 %v2621_v35  ;;  %2692 = vmatprep.subr.bf16.mxu1 %v2691_v61 }
 0x361   :  { %v1097_v19 = vpop.permute.xlu1 %1096  ;;  %v3730_v60 = vpop.permute.xlu0 %1012  ;;  %2694 = vmatpush1.bf16.msra.mxu1 %v2693_v5 }
 0x362   :  { %v1124_v46 = vsel %vm337_vm3, %v1097_v19, %v3566_v28  ;;  %v1128_v63 = vsel %vm337_vm3, %v3558_v15, %v1097_v19 }
 0x363   :  { %1100 = vrot.lane.b32.xlu1 %v3652_v7, %s2945_s27  ;;  %1016 = vrot.lane.b32.xlu0 %v3693_v20, %s2944_s3  ;;  %v3761_v31 = vmul.f32 %v3733_v13, %v1128_v63  ;;  %v3764_v5 = vmul.f32 %v3736_v26, %v1124_v46 }
 0x365   :  { %v1113_v11 = vpop.permute.xlu1 %1112  ;;  %v1099_v25 = vpop.permute.xlu0 %1098  ;;  %4858 = vst [vmem:[#allocation35_spill] sm:$0xff] %v3764_v5 }
 0x366   :  { %v1125_v35 = vsel %vm337_vm3, %v1099_v25, %v3576_v30  ;;  %v1129_v61 = vsel %vm337_vm3, %v3568_v44, %v1099_v25  ;;  %v1120_v25 = vsel %vm337_vm3, %v3566_v28, %v1113_v11  ;;  %v1132_v63 = vsel %vm337_vm3, %v1113_v11, %v3558_v15 }
 0x367   :  { %v3767_v19 = vmul.f32 %v3733_v13, %v1129_v61  ;;  %v3770_v52 = vmul.f32 %v3736_v26, %v1125_v35  ;;  %1116 = vrot.lane.b32.xlu1 %v3668_v23, %s2945_s27  ;;  %1102 = vrot.lane.b32.xlu0 %v3670_v1, %s2945_s27  ;;  %v3787_v13 = vrot.slane %v1238_v6, %v3187_v50 }
 0x368   :  { %v3790_v28 = vrot.slane %v1238_v6, %v3190_v51  ;;  %v3799_v46 = vmul.f32 %v3749_v37, %v1132_v63  ;;  %v3802_v5 = vmul.f32 %v3752_v9, %v1120_v25 }
 0x369   :  { %4859 = vst [vmem:[#allocation36_spill] sm:$0xff] %v3770_v52  ;;  %v1199_v35 = vpop.permute.xlu1 %1198  ;;  %v1115_v61 = vpop.permute.xlu0 %1114  ;;  %4860 = vst [vmem:[#allocation37_spill] sm:$0xff] %v3787_v13 }
 0x36a   :  { %4861 = vst [vmem:[#allocation38_spill] sm:$0xff] %v3790_v28  ;;  %v1121_v15 = vsel %vm337_vm3, %v3576_v30, %v1115_v61  ;;  %v1133_v11 = vsel %vm337_vm3, %v1115_v61, %v3568_v44  ;;  %4862 = vst [vmem:[#allocation39_spill] sm:$0xff] %v3799_v46  ;;  %v1226_v30 = vsel %vm381_vm4, %v1199_v35, %v3582_v56 }
 0x36b   :  { %v3805_v26 = vmul.f32 %v3749_v37, %v1133_v11  ;;  %v3808_v52 = vmul.f32 %v3752_v9, %v1121_v15  ;;  %1202 = vrot.lane.b32.xlu1 %v3652_v7, %s2946_s28  ;;  %v1230_v44 = vsel %vm381_vm4, %v3574_v55, %v1199_v35  ;;  %1118 = vrot.lane.b32.xlu0 %v3693_v20, %s2945_s27 }
 0x36c   :  { %v3825_v11 = vrot.slane %v1238_v6, %v3184_v49  ;;  %v3828_v9 = vrot.slane %v1238_v6, %v3162_v29  ;;  %v3837_v25 = vmul.f32 %v3787_v13, %v1230_v44  ;;  %v3840_v46 = vmul.f32 %v3790_v28, %v1226_v30 }
 0x36d   :  { %4863 = vst [vmem:[#allocation40_spill] sm:$0xff] %v3805_v26  ;;  %v1215_v63 = vpop.permute.xlu1 %1214  ;;  %v1201_v61 = vpop.permute.xlu0 %1200  ;;  %v1356_v26 = vld [vmem:[#allocation8 + $0x5] ss:$8 sm:$0xf] }
 0x36e   :  { %4864 = vst [vmem:[#allocation41_spill] sm:$0xff] %v3828_v9  ;;  %v1227_v35 = vsel %vm381_vm4, %v1201_v61, %v3592_v57  ;;  %v1231_v37 = vsel %vm381_vm4, %v3584_v16, %v1201_v61  ;;  %4865 = vst [vmem:[#allocation42_spill] sm:$0xff] %v3840_v46  ;;  %v1222_v61 = vsel %vm381_vm4, %v3582_v56, %v1215_v63 }
 0x36f   :  { %v3843_v15 = vmul.f32 %v3787_v13, %v1231_v37  ;;  %v3846_v6 = vmul.f32 %v3790_v28, %v1227_v35  ;;  %1218 = vrot.lane.b32.xlu1 %v3668_v23, %s2946_s28  ;;  %v1234_v44 = vsel %vm381_vm4, %v1215_v63, %v3574_v55  ;;  %1204 = vrot.lane.b32.xlu0 %v3670_v1, %s2946_s28 }
 0x370   :  { %v3863_v13 = vrot.slane %v1356_v26, %v3184_v49  ;;  %v3866_v56 = vrot.slane %v1356_v26, %v3187_v50  ;;  %v3875_v37 = vmul.f32 %v3825_v11, %v1234_v44  ;;  %v3878_v46 = vmul.f32 %v3828_v9, %v1222_v61 }
 0x371   :  { %4866 = vst [vmem:[#allocation43_spill] sm:$0xff] %v3846_v6  ;;  %v1317_v30 = vpop.permute.xlu1 %1316  ;;  %v1217_v35 = vpop.permute.xlu0 %1216 }
 0x372   :  { %4867 = vst [vmem:[#allocation44_spill] sm:$0xff] %v3863_v13  ;;  %4868 = vst [vmem:[#allocation45_spill] sm:$0xff] %v3866_v56  ;;  %v1223_v55 = vsel %vm381_vm4, %v3592_v57, %v1217_v35  ;;  %v1235_v63 = vsel %vm381_vm4, %v1217_v35, %v3584_v16  ;;  %v1344_v57 = vsel %vm429_vm5, %v1317_v30, %v3598_v12 }
 0x373   :  { %4869 = vst [vmem:[#allocation46_spill] sm:$0xff] %v3875_v37  ;;  %v3881_v28 = vmul.f32 %v3825_v11, %v1235_v63  ;;  %v3884_v6 = vmul.f32 %v3828_v9, %v1223_v55  ;;  %1630 = vrot.lane.b32.xlu1 %v3368_v59, %s2950_s30  ;;  %v1348_v16 = vsel %vm429_vm5, %v3590_v17, %v1317_v30 }
 0x374   :  { %1220 = vrot.lane.b32.xlu0 %v3693_v20, %s2946_s28  ;;  %v3901_v63 = vrot.slane %v1356_v26, %v3190_v51  ;;  %v3904_v59 = vrot.slane %v1356_v26, %v3162_v29  ;;  %v3913_v61 = vmul.f32 %v3863_v13, %v1348_v16  ;;  %v3916_v37 = vmul.f32 %v3866_v56, %v1344_v57 }
 0x375   :  { %4870 = vst [vmem:[#allocation47_spill] sm:$0xff] %v3881_v28  ;;  %v1333_v44 = vpop.permute.xlu1 %1332  ;;  %v1319_v35 = vpop.permute.xlu0 %1318  ;;  %v1458_v28 = vld [vmem:[#allocation8 + $0x6] ss:$8 sm:$0xf] }
 0x376   :  { %4871 = vst [vmem:[#allocation48_spill] sm:$0xff] %v3901_v63  ;;  %4872 = vst [vmem:[#allocation49_spill] sm:$0xff] %v3904_v59  ;;  %v1345_v30 = vsel %vm429_vm5, %v1319_v35, %v3608_v43  ;;  %v1349_v9 = vsel %vm429_vm5, %v3600_v4, %v1319_v35  ;;  %v1340_v35 = vsel %vm429_vm5, %v3598_v12, %v1333_v44 }
 0x377   :  { %4873 = vst [vmem:[#allocation50_spill] sm:$0xff] %v3913_v61  ;;  %4874 = vst [vmem:[#allocation51_spill] sm:$0xff] %v3916_v37  ;;  %v3919_v55 = vmul.f32 %v3863_v13, %v1349_v9  ;;  %v3922_v26 = vmul.f32 %v3866_v56, %v1345_v30  ;;  %1320 = vrot.lane.b32.xlu1 %v3652_v7, %s2947_s29  ;;  %v1352_v16 = vsel %vm429_vm5, %v1333_v44, %v3590_v17 }
 0x378   :  { %1632 = vrot.lane.b32.xlu0 %v3386_v36, %s2950_s30  ;;  %v3939_v56 = vrot.slane %v1458_v28, %v3184_v49  ;;  %v3942_v12 = vrot.slane %v1458_v28, %v3187_v50  ;;  %v3951_v9 = vmul.f32 %v3901_v63, %v1340_v35  ;;  %v3954_v61 = vmul.f32 %v3904_v59, %v1352_v16 }
 0x379   :  { %4875 = vst [vmem:[#allocation52_spill] sm:$0xff] %v3919_v55  ;;  %4876 = vst [vmem:[#allocation53_spill] sm:$0xff] %v3922_v26  ;;  %v1419_v57 = vpop.permute.xlu1 %1418  ;;  %v1335_v30 = vpop.permute.xlu0 %1334 }
 0x37a   :  { %4877 = vst [vmem:[#allocation54_spill] sm:$0xff] %v3939_v56  ;;  %4878 = vst [vmem:[#allocation55_spill] sm:$0xff] %v3942_v12  ;;  %v1341_v17 = vsel %vm429_vm5, %v3608_v43, %v1335_v30  ;;  %v1353_v44 = vsel %vm429_vm5, %v1335_v30, %v3600_v4  ;;  %v1446_v43 = vsel %vm473_vm6, %v1419_v57, %v3614_v41 }
 0x37b   :  { %4879 = vst [vmem:[#allocation56_spill] sm:$0xff] %v3951_v9  ;;  %4880 = vst [vmem:[#allocation57_spill] sm:$0xff] %v3954_v61  ;;  %v3957_v13 = vmul.f32 %v3901_v63, %v1341_v17  ;;  %v3960_v55 = vmul.f32 %v3904_v59, %v1353_v44  ;;  %1336 = vrot.lane.b32.xlu1 %v3668_v23, %s2947_s29  ;;  %v1450_v4 = vsel %vm473_vm6, %v3606_v58, %v1419_v57 }
 0x37c   :  { %1640 = vrot.lane.b32.xlu0 %v3458_v14, %s2950_s30  ;;  %v3977_v44 = vrot.slane %v1458_v28, %v3190_v51  ;;  %v3980_v59 = vrot.slane %v1458_v28, %v3162_v29  ;;  %v3989_v35 = vmul.f32 %v3939_v56, %v1450_v4  ;;  %v3992_v9 = vmul.f32 %v3942_v12, %v1446_v43 }
 0x37d   :  { %4881 = vst [vmem:[#allocation58_spill] sm:$0xff] %v3957_v13  ;;  %4882 = vst [vmem:[#allocation59_spill] sm:$0xff] %v3960_v55  ;;  %v1435_v16 = vpop.permute.xlu1 %1434  ;;  %v1421_v30 = vpop.permute.xlu0 %1420  ;;  %v1560_v13 = vld [vmem:[#allocation8 + $0x7] ss:$8 sm:$0xf] }
 0x37e   :  { %4883 = vst [vmem:[#allocation60_spill] sm:$0xff] %v3977_v44  ;;  %4884 = vst [vmem:[#allocation61_spill] sm:$0xff] %v3980_v59  ;;  %v1447_v57 = vsel %vm473_vm6, %v1421_v30, %v3624_v8  ;;  %v1451_v63 = vsel %vm473_vm6, %v3616_v47, %v1421_v30  ;;  %v1442_v30 = vsel %vm473_vm6, %v3614_v41, %v1435_v16 }
 0x37f   :  { %4885 = vst [vmem:[#allocation62_spill] sm:$0xff] %v3989_v35  ;;  %4886 = vst [vmem:[#allocation63_spill] sm:$0xff] %v3992_v9  ;;  %v3995_v17 = vmul.f32 %v3939_v56, %v1451_v63  ;;  %v3998_v28 = vmul.f32 %v3942_v12, %v1447_v57  ;;  %1422 = vrot.lane.b32.xlu1 %v3652_v7, %s2948_s1  ;;  %v1454_v4 = vsel %vm473_vm6, %v1435_v16, %v3606_v58 }
 0x380   :  { %1322 = vrot.lane.b32.xlu0 %v3670_v1, %s2947_s29  ;;  %v4015_v12 = vrot.slane %v1560_v13, %v3184_v49  ;;  %v4018_v41 = vrot.slane %v1560_v13, %v3187_v50  ;;  %v4027_v63 = vmul.f32 %v3977_v44, %v1442_v30  ;;  %v4030_v35 = vmul.f32 %v3980_v59, %v1454_v4 }
 0x381   :  { %4887 = vst [vmem:[#allocation64_spill] sm:$0xff] %v3995_v17  ;;  %4888 = vst [vmem:[#allocation65_spill] sm:$0xff] %v3998_v28  ;;  %v1521_v43 = vpop.permute.xlu1 %1520  ;;  %v1437_v57 = vpop.permute.xlu0 %1436 }
 0x382   :  { %4889 = vst [vmem:[#allocation66_spill] sm:$0xff] %v4015_v12  ;;  %4890 = vst [vmem:[#allocation67_spill] sm:$0xff] %v4018_v41  ;;  %v1443_v58 = vsel %vm473_vm6, %v3624_v8, %v1437_v57  ;;  %v1455_v16 = vsel %vm473_vm6, %v1437_v57, %v3616_v47  ;;  %v1548_v8 = vsel %vm517_vm7, %v1521_v43, %v3632_v10 }
 0x383   :  { %4891 = vst [vmem:[#allocation68_spill] sm:$0xff] %v4027_v63  ;;  %4892 = vst [vmem:[#allocation69_spill] sm:$0xff] %v4030_v35  ;;  %v4033_v56 = vmul.f32 %v3977_v44, %v1443_v58  ;;  %v4036_v17 = vmul.f32 %v3980_v59, %v1455_v16  ;;  %1438 = vrot.lane.b32.xlu1 %v3668_v23, %s2948_s1  ;;  %v1552_v47 = vsel %vm517_vm7, %v3622_v48, %v1521_v43  ;;  %v2491_v35 = vld [vmem:[#allocation4] sm:$0x1] }
 0x384   :  { %1338 = vrot.lane.b32.xlu0 %v3693_v20, %s2947_s29  ;;  %v4053_v16 = vrot.slane %v1560_v13, %v3190_v51  ;;  %v4056_v59 = vrot.slane %v1560_v13, %v3162_v29  ;;  %v4065_v30 = vmul.f32 %v4015_v12, %v1552_v47  ;;  %v4068_v63 = vmul.f32 %v4018_v41, %v1548_v8 }
 0x385   :  { %4893 = vst [vmem:[#allocation70_spill] sm:$0xff] %v4033_v56  ;;  %4894 = vst [vmem:[#allocation71_spill] sm:$0xff] %v4036_v17  ;;  %v1537_v4 = vpop.permute.xlu1 %1536  ;;  %v1523_v57 = vpop.permute.xlu0 %1522 }
 0x386   :  { %4895 = vst [vmem:[#allocation72_spill] sm:$0xff] %v4053_v16  ;;  %4896 = vst [vmem:[#allocation73_spill] sm:$0xff] %v4056_v59  ;;  %v1549_v43 = vsel %vm517_vm7, %v1523_v57, %v3644_v34  ;;  %v1553_v44 = vsel %vm517_vm7, %v3634_v24, %v1523_v57  ;;  %v1544_v56 = vsel %vm517_vm7, %v3632_v10, %v1537_v4 }
 0x387   :  { %4897 = vst [vmem:[#allocation74_spill] sm:$0xff] %v4065_v30  ;;  %4898 = vst [vmem:[#allocation75_spill] sm:$0xff] %v4068_v63  ;;  %v4071_v58 = vmul.f32 %v4015_v12, %v1553_v44  ;;  %v4074_v13 = vmul.f32 %v4018_v41, %v1549_v43  ;;  %1524 = vrot.lane.b32.xlu1 %v3652_v7, %s2949_s24  ;;  %v1556_v47 = vsel %vm517_vm7, %v1537_v4, %v3622_v48 }
 0x388   :  { %1424 = vrot.lane.b32.xlu0 %v3670_v1, %s2948_s1  ;;  %v4099_v4 = vmul.f32 %v4053_v16, %v1544_v56  ;;  %v4102_v12 = vmul.f32 %v4056_v59, %v1556_v47 }
 0x389   :  { %4899 = vst [vmem:[#allocation76_spill] sm:$0xff] %v4071_v58  ;;  %4900 = vst [vmem:[#allocation77_spill] sm:$0xff] %v4074_v13  ;;  %v4088_v8 = vpop.permute.xlu1 %1622  ;;  %v1539_v57 = vpop.permute.xlu0 %1538  ;;  %v1872_v58 = vld [vmem:[%s4728_s7] sm:$0xff]  ;;  %v1873_v13 = vld [vmem:[%s4728_s7 + $0x8] sm:$0xff] }
 0x38a   :  { %4901 = vst [vmem:[#allocation78_spill] sm:$0xff] %v4088_v8  ;;  %v1545_v10 = vsel %vm517_vm7, %v3644_v34, %v1539_v57  ;;  %v1557_v48 = vsel %vm517_vm7, %v1539_v57, %v3634_v24  ;;  %4902 = vst [vmem:[#allocation79_spill] sm:$0xff] %v4099_v4  ;;  %v1717_v57 = vld [vmem:[%s4727_s6 + $0x8] sm:$0xff]  ;;  %v1875_v8 = vld [vmem:[%s4728_s7 + $0x18] sm:$0xff] }
 0x38b   :  { %4903 = vst [vmem:[#allocation80_spill] sm:$0xff] %v4102_v12  ;;  %v4105_v44 = vmul.f32 %v4053_v16, %v1545_v10  ;;  %v4108_v30 = vmul.f32 %v4056_v59, %v1557_v48  ;;  %1540 = vrot.lane.b32.xlu1 %v3668_v23, %s2949_s24  ;;  %1973 = vmatprep.mubr.f32.mxu0 %v1717_v57  ;;  %v1874_v12 = vld [vmem:[%s4728_s7 + $0x10] sm:$0xff] }
 0x38c   :  { %1440 = vrot.lane.b32.xlu0 %v3693_v20, %s2948_s1  ;;  %2151 = vmatprep.mubr.f32.mxu1 %v1717_v57 }
 0x38d   :  { %4904 = vst [vmem:[#allocation81_spill] sm:$0xff] %v4105_v44  ;;  %4905 = vst [vmem:[#allocation82_spill] sm:$0xff] %v4108_v30  ;;  %v4116_v34 = vpop.permute.xlu1 %888  ;;  %v4118_v56 = vpop.permute.xlu0 %1624 }
 0x38e   :  { %4906 = vst [vmem:[#allocation83_spill] sm:$0xff] %v4118_v56 }
 0x38f   :  { %1638 = vrot.lane.b32.xlu1 %v3450_v45, %s2950_s30 }
 0x390   :  { %1526 = vrot.lane.b32.xlu0 %v3670_v1, %s2949_s24 }
 0x391   :  { %v4129_v10 = vpop.permute.xlu1 %904  ;;  %v4131_v48 = vpop.permute.xlu0 %890 }
 0x393   :  { %1618 = vrot.lane.b32.xlu1 %v3524_v3, %s2950_s30 }
 0x394   :  { %1542 = vrot.lane.b32.xlu0 %v3693_v20, %s2949_s24 }
 0x395   :  { %v4137_v24 = vpop.permute.xlu1 %990  ;;  %v4139_v47 = vpop.permute.xlu0 %906 }
 0x397   :  { %1626 = vrot.lane.b32.xlu1 %v3652_v7, %s2950_s30 }
 0x398   :  { %1620 = vrot.lane.b32.xlu0 %v3538_v18, %s2950_s30  ;;  %v1023_v18 = vsel %vm293_vm2, %v3723_v40, %v3560_v39 }
 0x399   :  { %v4145_v57 = vpop.permute.xlu1 %1006  ;;  %v4147_v43 = vpop.permute.xlu0 %992 }
 0x39b   :  { %1634 = vrot.lane.b32.xlu1 %v3536_v0, %s2950_s30 }
 0x39c   :  { %1636 = vrot.lane.b32.xlu0 %v3548_v38, %s2950_s30 }
 0x39d   :  { %v4153_v4 = vpop.permute.xlu1 %1092  ;;  %v4155_v44 = vpop.permute.xlu0 %1008 }
 0x39f   :  { %1642 = vrot.lane.b32.xlu1 %v3668_v23, %s2950_s30 }
 0x3a0   :  { %1628 = vrot.lane.b32.xlu0 %v3670_v1, %s2950_s30 }
 0x3a1   :  { %v4164_v59 = vpop.permute.xlu1 %1108  ;;  %v4166_v16 = vpop.permute.xlu0 %1094 }
 0x3a3   :  { %1878 = vperm.xlu1 %2831, %v1872_v58   ;;  %v2298_v58 = vld [vmem:[%s4730_s9] sm:$0xff] }
 0x3a4   :  { %1644 = vrot.lane.b32.xlu0 %v3693_v20, %s2950_s30 }
 0x3a5   :  { %v4173_v30 = vpop.permute.xlu1 %1194  ;;  %v4175_v63 = vpop.permute.xlu0 %1110 }
 0x3a7   :  { %1888 = vperm.xlu1 %2831, %v1874_v12   ;;  %v2457_v12 = vld [vmem:[%s4731_s10] sm:$0xff] }
 0x3a8   :  { %1883 = vperm.xlu0 %2830, %v1873_v13  }
 0x3a9   :  { %v4183_v41 = vpop.permute.xlu1 %1210  ;;  %v4185_v56 = vpop.permute.xlu0 %1196 }
 0x3ab   :  { %2301 = vperm.xlu1 %2831, %v2298_v58  }
 0x3ac   :  { %1893 = vperm.xlu0 %2830, %v1875_v8  }
 0x3ad   :  { %v4190_v17 = vpop.permute.xlu1 %1312  ;;  %v4192_v9 = vpop.permute.xlu0 %1212 }
 0x3ae   :  { %4907 = vst [vmem:[#allocation84_spill] sm:$0xff] %v4190_v17 }
 0x3af   :  { %2494 = vperm.xlu1 %2831, %v2491_v35  }
 0x3b0   :  { %2460 = vperm.xlu0 %2830, %v2457_v12   ;;  %v1034_v12 = vld [vmem:[#allocation8 + $0x1] ss:$8 sm:$0xf] }
 0x3b1   :  { %v4197_v13 = vpop.permute.xlu1 %1328  ;;  %v4199_v28 = vpop.permute.xlu0 %1314 }
 0x3b2   :  { %4908 = vst [vmem:[#allocation85_spill] sm:$0xff] %v4197_v13  ;;  %4909 = vst [vmem:[#allocation86_spill] sm:$0xff] %v4199_v28 }
 0x3b5   :  { %v4201_v61 = vpop.permute.xlu1 %1414  ;;  %v4203_v55 = vpop.permute.xlu0 %1330 }
 0x3b6   :  { %4910 = vst [vmem:[#allocation87_spill] sm:$0xff] %v4201_v61  ;;  %4911 = vst [vmem:[#allocation88_spill] sm:$0xff] %v4203_v55  ;;  %v1043_v61 = vrot.slane %v1034_v12, %v3187_v50  ;;  %v4238_v50 = vrot.slane %v1034_v12, %v3162_v29  ;;  %v1018_v55 = vsel %vm293_vm2, %v3550_v54, %v3721_v21 }
 0x3b9   :  { %v4205_v8 = vpop.permute.xlu1 %1430  ;;  %v4207_v58 = vpop.permute.xlu0 %1416 }
 0x3ba   :  { %4912 = vst [vmem:[#allocation89_spill] sm:$0xff] %v4205_v8  ;;  %4913 = vst [vmem:[#allocation90_spill] sm:$0xff] %v4207_v58  ;;  %v1026_v8 = vsel %vm293_vm2, %v3540_v33, %v3698_v42 }
 0x3bb   :  { %v1057_v28 = vmul.f32 %v1043_v61, %v1026_v8 }
 0x3bd   :  { %v4209_v37 = vpop.permute.xlu1 %1516  ;;  %v4211_v26 = vpop.permute.xlu0 %1432 }
 0x3be   :  { %4914 = vst [vmem:[#allocation91_spill] sm:$0xff] %v4209_v37  ;;  %4915 = vst [vmem:[#allocation92_spill] sm:$0xff] %v4211_v26 }
 0x3c1   :  { %v4213_v17 = vpop.permute.xlu1 %1532  ;;  %v4215_v35 = vpop.permute.xlu0 %1518 }
 0x3c2   :  { %4916 = vst [vmem:[#allocation93_spill] sm:$0xff] %v4213_v17  ;;  %4917 = vst [vmem:[#allocation94_spill] sm:$0xff] %v4215_v35  ;;  %v4228_v17 = vrot.slane %v1034_v12, %v3190_v51  ;;  %v1022_v35 = vsel %vm293_vm2, %v3698_v42, %v3550_v54  ;;  %v1027_v51 = vsel %vm293_vm2, %v3552_v2, %v3723_v40 }
 0x3c5   :  { %v897_v38 = vpop.permute.xlu1 %896  ;;  %v4217_v0 = vpop.permute.xlu0 %1534 }
 0x3c6   :  { %4918 = vst [vmem:[#allocation95_spill] sm:$0xff] %v4217_v0  ;;  %v926_v37 = vsel %vm250_vm1, %v4116_v34, %v897_v38  ;;  %v4235_v0 = vrot.slane %v1034_v12, %v3184_v49  ;;  %v1019_v12 = vsel %vm293_vm2, %v3560_v39, %v3730_v60  ;;  %v1030_v49 = vsel %vm293_vm2, %v3721_v21, %v3540_v33 }
 0x3c7   :  { %v963_v8 = vmul.f32 %v3659_v22, %v926_v37  ;;  %v1031_v33 = vsel %vm293_vm2, %v3730_v60, %v3552_v2  ;;  %v922_v21 = vsel %vm250_vm1, %v897_v38, %v4129_v10 }
 0x3c9   :  { %v913_v58 = vpop.permute.xlu1 %912  ;;  %v899_v26 = vpop.permute.xlu0 %898 }
 0x3ca   :  { %v927_v42 = vsel %vm250_vm1, %v4131_v48, %v899_v26  ;;  %v923_v54 = vsel %vm250_vm1, %v899_v26, %v4139_v47  ;;  %v918_v37 = vsel %vm250_vm1, %v4129_v10, %v913_v58  ;;  %v930_v26 = vsel %vm250_vm1, %v913_v58, %v4116_v34 }
 0x3cb   :  { %v967_v29 = vmul.f32 %v3659_v22, %v927_v42  ;;  %v1061_v22 = vmul.f32 %v1043_v61, %v1027_v51  ;;  %v1063_v42 = vmul.f32 %v4238_v50, %v1019_v12  ;;  %v968_v13 = vmul.f32 %v3701_v53, %v923_v54 }
 0x3cc   :  { %v962_v2 = vmul.f32 %v3677_v62, %v930_v26  ;;  %v965_v60 = vmul.f32 %v3680_v32, %v918_v37  ;;  %v1056_v10 = vmul.f32 %v4235_v0, %v1030_v49  ;;  %v1059_v58 = vmul.f32 %v4238_v50, %v1018_v55 }
 0x3cd   :  { %v999_v3 = vpop.permute.xlu1 %998  ;;  %v915_v39 = vpop.permute.xlu0 %914  ;;  %v2623_v40 = vpack.c.bf16 %v967_v29, %v963_v8  ;;  %v964_v12 = vmul.f32 %v3701_v53, %v922_v21  ;;  %v1062_v8 = vmul.f32 %v4228_v17, %v1023_v18  ;;  %v1060_v54 = vmul.f32 %v4235_v0, %v1031_v33 }
 0x3ce   :  { %v919_v34 = vsel %vm250_vm1, %v4139_v47, %v915_v39  ;;  %v931_v51 = vsel %vm250_vm1, %v915_v39, %v4131_v48  ;;  %v1028_v47 = vsel %vm293_vm2, %v4137_v24, %v999_v3  ;;  %v2627_v55 = vpack.c.bf16 %v1061_v22, %v1057_v28 }
 0x3cf   :  { %v966_v38 = vmul.f32 %v3677_v62, %v931_v51  ;;  %v969_v29 = vmul.f32 %v3680_v32, %v919_v34  ;;  %2624 = vmatprep.subr.bf16.mxu0 %v2623_v40  ;;  %v2697_v32 = vpack.c.bf16 %v968_v13, %v964_v12  ;;  %v2699_v39 = vpack.c.bf16 %v1063_v42, %v1059_v58 }
 0x3d0   :  { %v1065_v53 = vmul.f32 %v1043_v61, %v1028_v47  ;;  %v1058_v18 = vmul.f32 %v4228_v17, %v1022_v35  ;;  %v2629_v22 = vpack.c.bf16 %v1060_v54, %v1056_v10 }
 0x3d1   :  { %v1015_v48 = vpop.permute.xlu1 %1014  ;;  %v2625_v37 = vpack.c.bf16 %v966_v38, %v962_v2  ;;  %v1001_v62 = vpop.permute.xlu0 %1000  ;;  %v2695_v26 = vpack.c.bf16 %v969_v29, %v965_v60 }
 0x3d2   :  { %v1029_v49 = vsel %vm293_vm2, %v4147_v43, %v1001_v62  ;;  %v1025_v21 = vsel %vm293_vm2, %v1001_v62, %v4155_v44  ;;  %v1020_v13 = vsel %vm293_vm2, %v4145_v57, %v1015_v48  ;;  %v1032_v33 = vsel %vm293_vm2, %v1015_v48, %v4137_v24  ;;  %v4919_v48 = vld [vmem:[#allocation31_spill] sm:$0xff] }
 0x3d3   :  { %v1069_v40 = vmul.f32 %v1043_v61, %v1029_v49  ;;  %2626 = vmatpush1.bf16.msra.mxu0 %v2625_v37  ;;  %2696 = vmatprep.subr.bf16.mxu1 %v2695_v26  ;;  %v1024_v61 = vsel %vm293_vm2, %v999_v3, %v4145_v57  ;;  %v2701_v35 = vpack.c.bf16 %v1062_v8, %v1058_v18  ;;  %v4924_v18 = vld [vmem:[#allocation34_spill] sm:$0xff] }
 0x3d4   :  { %2628 = vmatprep.subr.bf16.mxu0 %v2627_v55  ;;  %2698 = vmatpush1.bf16.msra.mxu1 %v2697_v32  ;;  %v1070_v51 = vmul.f32 %v4228_v17, %v1025_v21  ;;  %v1064_v60 = vmul.f32 %v4235_v0, %v1032_v33  ;;  %v1067_v38 = vmul.f32 %v4238_v50, %v1020_v13  ;;  %v4926_v33 = vld [vmem:[#allocation39_spill] sm:$0xff] }
 0x3d5   :  { %v1101_v28 = vpop.permute.xlu1 %1100  ;;  %2700 = vmatprep.subr.bf16.mxu1 %v2699_v39  ;;  %v1017_v42 = vpop.permute.xlu0 %1016  ;;  %v2631_v34 = vpack.c.bf16 %v1069_v40, %v1065_v53  ;;  %v1066_v29 = vmul.f32 %v4228_v17, %v1024_v61  ;;  %v4920_v62 = vpack.c.bf16 %v3767_v19, %v3761_v31  ;;  %v4921_v49 = vpack.c.bf16 %v3808_v52, %v3802_v5  ;;  %v4922_v53 = vld [vmem:[#allocation32_spill] sm:$0xff]  ;;  %v4923_v19 = vld [vmem:[#allocation33_spill] sm:$0xff]  ;;  %v4929_v61 = vld [vmem:[#allocation35_spill] sm:$0xff] }
 0x3d6   :  { %v1021_v2 = vsel %vm293_vm2, %v4155_v44, %v1017_v42  ;;  %v1033_v24 = vsel %vm293_vm2, %v1017_v42, %v4147_v43  ;;  %v1130_v10 = vsel %vm337_vm3, %v4153_v4, %v1101_v28  ;;  %v1126_v32 = vsel %vm337_vm3, %v1101_v28, %v4164_v59  ;;  %v4925_v52 = vld [vmem:[#allocation40_spill] sm:$0xff] }
 0x3d7   :  { %v1068_v3 = vmul.f32 %v4235_v0, %v1033_v24  ;;  %v1071_v57 = vmul.f32 %v4238_v50, %v1021_v2  ;;  %2630 = vmatpush1.bf16.msra.mxu0 %v2629_v22  ;;  %v2705_v47 = vpack.c.bf16 %v1070_v51, %v1066_v29  ;;  %v1167_v50 = vmul.f32 %v4919_v48, %v1130_v10 }
 0x3d8   :  { %2632 = vmatprep.subr.bf16.mxu0 %v2631_v34  ;;  %2702 = vmatpush1.bf16.msra.mxu1 %v2701_v35  ;;  %v4927_v28 = vpack.c.bf16 %v4925_v52, %v4926_v33  ;;  %v1168_v22 = vmul.f32 %v4922_v53, %v1126_v32  ;;  %v4940_v32 = vld [vmem:[#allocation42_spill] sm:$0xff]  ;;  %v4946_v33 = vld [vmem:[#allocation20_spill] sm:$0xff] }
 0x3d9   :  { %v1117_v44 = vpop.permute.xlu1 %1116  ;;  %v2633_v58 = vpack.c.bf16 %v1068_v3, %v1064_v60  ;;  %v1103_v43 = vpop.permute.xlu0 %1102  ;;  %v2703_v12 = vpack.c.bf16 %v1071_v57, %v1067_v38  ;;  %v4931_v38 = vld [vmem:[#allocation37_spill] sm:$0xff]  ;;  %v4945_v52 = vld [vmem:[#allocation22_spill] sm:$0xff] }
 0x3da   :  { %v1131_v0 = vsel %vm337_vm3, %v4166_v16, %v1103_v43  ;;  %v1127_v17 = vsel %vm337_vm3, %v1103_v43, %v4175_v63  ;;  %v1122_v54 = vsel %vm337_vm3, %v4164_v59, %v1117_v44  ;;  %v1134_v37 = vsel %vm337_vm3, %v1117_v44, %v4153_v4 }
 0x3db   :  { %v1171_v8 = vmul.f32 %v4919_v48, %v1131_v0  ;;  %2634 = vmatpush1.bf16.msra.mxu0 %v2633_v58  ;;  %2704 = vmatprep.subr.bf16.mxu1 %v2703_v12  ;;  %v1172_v21 = vmul.f32 %v4922_v53, %v1127_v17  ;;  %v1166_v40 = vmul.f32 %v4923_v19, %v1134_v37  ;;  %v4937_v37 = vld [vmem:[#allocation46_spill] sm:$0xff] }
 0x3dc   :  { %2636 = vmatprep.subr.bf16.mxu0 %v4920_v62  ;;  %2706 = vmatpush1.bf16.msra.mxu1 %v2705_v47  ;;  %v1169_v59 = vmul.f32 %v4924_v18, %v1122_v54  ;;  %v4932_v58 = vpack.c.bf16 %v3843_v15, %v3837_v25  ;;  %v4933_v47 = vpack.c.bf16 %v3884_v6, %v3878_v46  ;;  %v4936_v6 = vld [vmem:[#allocation47_spill] sm:$0xff] }
 0x3dd   :  { %v1203_v26 = vpop.permute.xlu1 %1202  ;;  %2708 = vmatprep.subr.bf16.mxu1 %v4921_v49  ;;  %v1119_v55 = vpop.permute.xlu0 %1118  ;;  %v2639_v39 = vpack.c.bf16 %v1171_v8, %v1167_v50  ;;  %v2713_v24 = vpack.c.bf16 %v1172_v21, %v1168_v22  ;;  %v4934_v50 = vld [vmem:[#allocation38_spill] sm:$0xff]  ;;  %v4935_v8 = vld [vmem:[#allocation41_spill] sm:$0xff]  ;;  %v4938_v62 = vpack.c.bf16 %v4936_v6, %v4937_v37  ;;  %v2727_v22 = vpack.c.bf16 %v3693_v20, %v3668_v23 }
 0x3de   :  { %v1123_v4 = vsel %vm337_vm3, %v4175_v63, %v1119_v55  ;;  %v1135_v31 = vsel %vm337_vm3, %v1119_v55, %v4166_v16  ;;  %v1232_v63 = vsel %vm381_vm4, %v4173_v30, %v1203_v26  ;;  %v4928_v16 = vld [vmem:[#allocation36_spill] sm:$0xff]  ;;  %v1228_v12 = vsel %vm381_vm4, %v1203_v26, %v4183_v41  ;;  %v4953_v20 = vld [vmem:[#allocation26_spill] sm:$0xff]  ;;  %v4965_v6 = vld [vmem:[#allocation49_spill] sm:$0xff] }
 0x3df   :  { %v1170_v13 = vmul.f32 %v4923_v19, %v1135_v31  ;;  %v1173_v5 = vmul.f32 %v4924_v18, %v1123_v4  ;;  %2638 = vmatpush1.bf16.msra.mxu0 %v4927_v28  ;;  %v4930_v42 = vpack.c.bf16 %v4928_v16, %v4929_v61  ;;  %v1269_v3 = vmul.f32 %v4931_v38, %v1232_v63  ;;  %v4943_v4 = vld [vmem:[#allocation24_spill] sm:$0xff] }
 0x3e0   :  { %2640 = vmatprep.subr.bf16.mxu0 %v2639_v39  ;;  %v1270_v26 = vmul.f32 %v4934_v50, %v1228_v12  ;;  %v2723_v19 = vpack.c.bf16 %v3458_v14, %v3450_v45  ;;  %v4947_v28 = vpack.c.bf16 %v4945_v52, %v4946_v33  ;;  %v4948_v45 = vld [vmem:[#allocation85_spill] sm:$0xff]  ;;  %v4974_v33 = vld [vmem:[#allocation92_spill] sm:$0xff] }
 0x3e1   :  { %2710 = vmatpush1.bf16.msra.mxu1 %v4930_v42  ;;  %v1219_v34 = vpop.permute.xlu1 %1218  ;;  %v2641_v35 = vpack.c.bf16 %v1170_v13, %v1166_v40  ;;  %v1205_v51 = vpop.permute.xlu0 %1204  ;;  %v2711_v2 = vpack.c.bf16 %v1173_v5, %v1169_v59  ;;  %v2655_v59 = vpack.c.bf16 %v3670_v1, %v3652_v7  ;;  %v4944_v13 = vld [vmem:[#allocation21_spill] sm:$0xff]  ;;  %v4950_v7 = vld [vmem:[#allocation27_spill] sm:$0xff] }
 0x3e2   :  { %v1233_v60 = vsel %vm381_vm4, %v4185_v56, %v1205_v51  ;;  %v1229_v57 = vsel %vm381_vm4, %v1205_v51, %v4192_v9  ;;  %v1224_v10 = vsel %vm381_vm4, %v4183_v41, %v1219_v34  ;;  %v1236_v44 = vsel %vm381_vm4, %v1219_v34, %v4173_v30  ;;  %v4949_v1 = vld [vmem:[#allocation25_spill] sm:$0xff]  ;;  %v4952_v34 = vld [vmem:[#allocation86_spill] sm:$0xff] }
 0x3e3   :  { %v1273_v29 = vmul.f32 %v4931_v38, %v1233_v60  ;;  %2642 = vmatpush1.bf16.msra.mxu0 %v2641_v35  ;;  %2712 = vmatprep.subr.bf16.mxu1 %v2711_v2  ;;  %v1274_v17 = vmul.f32 %v4934_v50, %v1229_v57  ;;  %v1268_v30 = vmul.f32 %v3825_v11, %v1236_v44  ;;  %v4954_v35 = vld [vmem:[#allocation28_spill] sm:$0xff]  ;;  %v4956_v60 = vld [vmem:[#allocation45_spill] sm:$0xff]  ;;  %v4958_v44 = vld [vmem:[#allocation51_spill] sm:$0xff] }
 0x3e4   :  { %2644 = vmatprep.subr.bf16.mxu0 %v4932_v58  ;;  %v1271_v41 = vmul.f32 %v4935_v8, %v1224_v10  ;;  %v2725_v5 = vpack.c.bf16 %v3386_v36, %v4944_v13  ;;  %v2657_v61 = vpack.c.bf16 %v4950_v7, %v4949_v1  ;;  %v4951_v36 = vld [vmem:[#allocation88_spill] sm:$0xff]  ;;  %v2729_v51 = vpack.c.bf16 %v4954_v35, %v4953_v20  ;;  %v4957_v10 = vld [vmem:[#allocation53_spill] sm:$0xff]  ;;  %v4981_v35 = vld [vmem:[#allocation18_spill] sm:$0xff] }
 0x3e5   :  { %2714 = vmatpush1.bf16.msra.mxu1 %v2713_v24  ;;  %v4393_v43 = vpop.permute.xlu1 %1630  ;;  %v2647_v48 = vpack.c.bf16 %v1273_v29, %v1269_v3  ;;  %v2721_v21 = vpack.c.bf16 %v1274_v17, %v1270_v26  ;;  %v4955_v2 = vld [vmem:[#allocation84_spill] sm:$0xff]  ;;  %v4959_v58 = vpack.c.bf16 %v4957_v10, %v4958_v44  ;;  %v4962_v50 = vld [vmem:[#allocation57_spill] sm:$0xff] }
 0x3e6   :  { %2716 = vmatprep.subr.bf16.mxu1 %v4933_v47  ;;  %v1221_v0 = vpop.permute.xlu0 %1220  ;;  %v4960_v47 = vld [vmem:[#allocation44_spill] sm:$0xff] }
 0x3e7   :  { %v1225_v25 = vsel %vm381_vm4, %v4192_v9, %v1221_v0  ;;  %v1237_v15 = vsel %vm381_vm4, %v1221_v0, %v4185_v56  ;;  %2646 = vmatpush1.bf16.msra.mxu0 %v4938_v62  ;;  %v4939_v9 = vld [vmem:[#allocation43_spill] sm:$0xff] }
 0x3e8   :  { %v1272_v54 = vmul.f32 %v3825_v11, %v1237_v15  ;;  %v1275_v46 = vmul.f32 %v4935_v8, %v1225_v25  ;;  %2648 = vmatprep.subr.bf16.mxu0 %v2647_v48  ;;  %v4941_v49 = vpack.c.bf16 %v4939_v9, %v4940_v32  ;;  %v4942_v11 = vld [vmem:[#allocation23_spill] sm:$0xff]  ;;  %v4966_v9 = vld [vmem:[#allocation52_spill] sm:$0xff]  ;;  %v4967_v32 = vld [vmem:[#allocation50_spill] sm:$0xff] }
 0x3e9   :  { %v1321_v56 = vpop.permute.xlu1 %1320  ;;  %v2651_v31 = vpack.c.bf16 %v4943_v4, %v4942_v11  ;;  %v4961_v48 = vld [vmem:[#allocation59_spill] sm:$0xff] }
 0x3ea   :  { %2718 = vmatpush1.bf16.msra.mxu1 %v4941_v49  ;;  %v2649_v55 = vpack.c.bf16 %v1272_v54, %v1268_v30  ;;  %v4419_v39 = vpop.permute.xlu0 %1632  ;;  %v2719_v53 = vpack.c.bf16 %v1275_v46, %v1271_v41  ;;  %v1346_v14 = vsel %vm429_vm5, %v1321_v56, %v4948_v45  ;;  %v1350_v24 = vsel %vm429_vm5, %v4955_v2, %v1321_v56  ;;  %v4964_v54 = vld [vmem:[#allocation48_spill] sm:$0xff]  ;;  %v4969_v56 = vld [vmem:[#allocation89_spill] sm:$0xff] }
 0x3eb   :  { %v1387_v38 = vmul.f32 %v4956_v60, %v1346_v14  ;;  %v4963_v17 = vpack.c.bf16 %v4961_v48, %v4962_v50  ;;  %v1386_v30 = vmul.f32 %v4960_v47, %v1350_v24  ;;  %v4968_v49 = vpack.c.bf16 %v4966_v9, %v4967_v32  ;;  %v4976_v14 = vld [vmem:[#allocation55_spill] sm:$0xff]  ;;  %v4988_v50 = vld [vmem:[#allocation61_spill] sm:$0xff]  ;;  %v4996_v9 = vld [vmem:[#allocation30_spill] sm:$0xff] }
 0x3ec   :  { %2650 = vmatpush1.bf16.msra.mxu0 %v2649_v55  ;;  %2720 = vmatprep.subr.bf16.mxu1 %v2719_v53  ;;  %v4970_v53 = vld [vmem:[#allocation58_spill] sm:$0xff] }
 0x3ed   :  { %2652 = vmatprep.subr.bf16.mxu0 %v2651_v31  ;;  %v1337_v40 = vpop.permute.xlu1 %1336  ;;  %v1662_v31 = vld [vmem:[#allocation8 + $0x20] ss:$8 sm:$0xf] }
 0x3ee   :  { %2722 = vmatpush1.bf16.msra.mxu1 %v2721_v21  ;;  %v4425_v18 = vpop.permute.xlu0 %1640  ;;  %v1342_v57 = vsel %vm429_vm5, %v4948_v45, %v1337_v40  ;;  %v1354_v29 = vsel %vm429_vm5, %v1337_v40, %v4955_v2  ;;  %v4971_v21 = vld [vmem:[#allocation56_spill] sm:$0xff]  ;;  %v4982_v2 = vld [vmem:[#allocation19_spill] sm:$0xff] }
 0x3ef   :  { %2724 = vmatprep.subr.bf16.mxu1 %v2723_v19  ;;  %v1388_v46 = vmul.f32 %v4964_v54, %v1342_v57  ;;  %v1389_v37 = vmul.f32 %v4965_v6, %v1354_v29  ;;  %v4972_v11 = vpack.c.bf16 %v4970_v53, %v4971_v21  ;;  %v4514_v24 = vrot.slane %v1662_v31, %v4982_v2  ;;  %v4985_v57 = vld [vmem:[#allocation69_spill] sm:$0xff]  ;;  %v4999_v53 = vld [vmem:[#allocation68_spill] sm:$0xff] }
 0x3f0   :  { %2654 = vmatpush1.bf16.msra.mxu0 %v4947_v28 }
 0x3f1   :  { %2656 = vmatprep.subr.bf16.mxu0 %v2655_v59  ;;  %v1423_v63 = vpop.permute.xlu1 %1422 }
 0x3f2   :  { %2726 = vmatpush1.bf16.msra.mxu1 %v2725_v5  ;;  %v1323_v16 = vpop.permute.xlu0 %1322  ;;  %v1448_v55 = vsel %vm473_vm6, %v1423_v63, %v4969_v56  ;;  %v4973_v5 = vld [vmem:[#allocation87_spill] sm:$0xff] }
 0x3f3   :  { %2728 = vmatprep.subr.bf16.mxu1 %v2727_v22  ;;  %v1347_v42 = vsel %vm429_vm5, %v1323_v16, %v4951_v36  ;;  %v1351_v23 = vsel %vm429_vm5, %v4952_v34, %v1323_v16  ;;  %v1452_v52 = vsel %vm473_vm6, %v4973_v5, %v1423_v63  ;;  %v4975_v22 = vld [vmem:[#allocation90_spill] sm:$0xff]  ;;  %v1489_v16 = vmul.f32 %v4976_v14, %v1448_v55 }
 0x3f4   :  { %v1391_v3 = vmul.f32 %v4956_v60, %v1347_v42  ;;  %2658 = vmatpush1.bf16.msra.mxu0 %v2657_v61  ;;  %v1390_v0 = vmul.f32 %v4960_v47, %v1351_v23  ;;  %v4977_v61 = vld [vmem:[#allocation17_spill] sm:$0xff]  ;;  %v4983_v60 = vld [vmem:[#allocation54_spill] sm:$0xff] }
 0x3f5   :  { %2660 = vmatprep.subr.bf16.mxu0 %v4959_v58  ;;  %v1439_v12 = vpop.permute.xlu1 %1438  ;;  %v4502_v63 = vrot.slane %v1662_v31, %v4977_v61  ;;  %v4978_v42 = vld [vmem:[#allocation65_spill] sm:$0xff]  ;;  %v1488_v58 = vmul.f32 %v4983_v60, %v1452_v52  ;;  %v4998_v55 = vld [vmem:[#allocation70_spill] sm:$0xff]  ;;  %v5001_v52 = vld [vmem:[#allocation91_spill] sm:$0xff] }
 0x3f6   :  { %2730 = vmatpush1.bf16.msra.mxu1 %v2729_v51  ;;  %v1339_v25 = vpop.permute.xlu0 %1338  ;;  %v2663_v15 = vpack.c.bf16 %v1391_v3, %v1387_v38  ;;  %v2665_v19 = vpack.c.bf16 %v1390_v0, %v1386_v30  ;;  %v1444_v1 = vsel %vm473_vm6, %v4969_v56, %v1439_v12  ;;  %v4511_v51 = vrot.slane %v1662_v31, %v4981_v35  ;;  %v4984_v3 = vld [vmem:[#allocation71_spill] sm:$0xff] }
 0x3f7   :  { %2732 = vmatprep.subr.bf16.mxu1 %v4963_v17  ;;  %v1343_v8 = vsel %vm429_vm5, %v4951_v36, %v1339_v25  ;;  %v1355_v41 = vsel %vm429_vm5, %v1339_v25, %v4952_v34  ;;  %v1456_v36 = vsel %vm473_vm6, %v1439_v12, %v4973_v5  ;;  %v4979_v34 = vld [vmem:[#allocation63_spill] sm:$0xff]  ;;  %v4986_v29 = vpack.c.bf16 %v4984_v3, %v4985_v57  ;;  %v4987_v12 = vld [vmem:[#allocation60_spill] sm:$0xff]  ;;  %v4989_v25 = vld [vmem:[#allocation93_spill] sm:$0xff] }
 0x3f8   :  { %v1392_v62 = vmul.f32 %v4964_v54, %v1343_v8  ;;  %v1393_v26 = vmul.f32 %v4965_v6, %v1355_v41  ;;  %2662 = vmatpush1.bf16.msra.mxu0 %v4968_v49  ;;  %v4980_v23 = vpack.c.bf16 %v4978_v42, %v4979_v34  ;;  %v1490_v47 = vmul.f32 %v4987_v12, %v1444_v1  ;;  %v4990_v41 = vld [vmem:[#allocation64_spill] sm:$0xff]  ;;  %v4991_v54 = vld [vmem:[#allocation62_spill] sm:$0xff]  ;;  %v5006_v35 = vld [vmem:[#allocation75_spill] sm:$0xff] }
 0x3f9   :  { %2664 = vmatprep.subr.bf16.mxu0 %v2663_v15  ;;  %v1525_v4 = vpop.permute.xlu1 %1524  ;;  %v1491_v17 = vmul.f32 %v4988_v50, %v1456_v36  ;;  %v4993_v6 = vld [vmem:[#allocation78_spill] sm:$0xff]  ;;  %v4997_v49 = vld [vmem:[#allocation16_spill] sm:$0xff]  ;;  %v5000_v21 = vpack.c.bf16 %v4998_v55, %v4999_v53 }
 0x3fa   :  { %2734 = vmatpush1.bf16.msra.mxu1 %v4972_v11  ;;  %v2737_v40 = vpack.c.bf16 %v1392_v62, %v1388_v46  ;;  %v1425_v59 = vpop.permute.xlu0 %1424  ;;  %v2735_v13 = vpack.c.bf16 %v1393_v26, %v1389_v37  ;;  %v1550_v15 = vsel %vm517_vm7, %v1525_v4, %v4989_v25  ;;  %v4992_v46 = vpack.c.bf16 %v4990_v41, %v4991_v54  ;;  %v4994_v37 = vld [vmem:[#allocation29_spill] sm:$0xff]  ;;  %v4995_v26 = vld [vmem:[#allocation83_spill] sm:$0xff]  ;;  %v5014_v54 = vld [vmem:[#allocation76_spill] sm:$0xff] }
 0x3fb   :  { %v1449_v28 = vsel %vm473_vm6, %v1425_v59, %v4974_v33  ;;  %v1453_v45 = vsel %vm473_vm6, %v4975_v22, %v1425_v59  ;;  %v1654_v62 = vsel %vm561_vm8, %v4994_v37, %v4993_v6  ;;  %v1655_v32 = vsel %vm561_vm8, %v4996_v9, %v4995_v26 }
 0x3fc   :  { %v1493_v7 = vmul.f32 %v4976_v14, %v1449_v28  ;;  %2666 = vmatpush1.bf16.msra.mxu0 %v2665_v19  ;;  %2736 = vmatprep.subr.bf16.mxu1 %v2735_v13  ;;  %v1492_v38 = vmul.f32 %v4983_v60, %v1453_v45  ;;  %v4546_v56 = vrot.slane %v1662_v31, %v4997_v49  ;;  %v5004_v14 = vld [vmem:[#allocation94_spill] sm:$0xff]  ;;  %v5018_v49 = vld [vmem:[#allocation79_spill] sm:$0xff] }
 0x3fd   :  { %2668 = vmatprep.subr.bf16.mxu0 %v4980_v23  ;;  %v1541_v20 = vpop.permute.xlu1 %1540  ;;  %v1651_v19 = vsel %vm561_vm8, %v4995_v26, %v4419_v39  ;;  %v1554_v31 = vsel %vm517_vm7, %v5001_v52, %v1525_v4  ;;  %v1650_v36 = vsel %vm561_vm8, %v4993_v6, %v4393_v43  ;;  %v5005_v23 = vld [vmem:[#allocation77_spill] sm:$0xff]  ;;  %v1659_v60 = vsel %vm561_vm8, %v4425_v18, %v4996_v9 }
 0x3fe   :  { %2738 = vmatpush1.bf16.msra.mxu1 %v2737_v40  ;;  %v1441_v10 = vpop.permute.xlu0 %1440  ;;  %v2671_v44 = vpack.c.bf16 %v1493_v7, %v1489_v16  ;;  %v2673_v40 = vpack.c.bf16 %v1492_v38, %v1488_v58  ;;  %v1546_v1 = vsel %vm517_vm7, %v4989_v25, %v1541_v20  ;;  %v1558_v7 = vsel %vm517_vm7, %v1541_v20, %v5001_v52  ;;  %v5008_v38 = vld [vmem:[#allocation66_spill] sm:$0xff] }
 0x3ff   :  { %2740 = vmatprep.subr.bf16.mxu1 %v4986_v29  ;;  %v1445_v0 = vsel %vm473_vm6, %v4974_v33, %v1441_v10  ;;  %v1457_v48 = vsel %vm473_vm6, %v1441_v10, %v4975_v22  ;;  %v5002_v33 = vld [vmem:[#allocation67_spill] sm:$0xff]  ;;  %v1689_v42 = vmul.f32 %v4511_v51, %v1651_v19  ;;  %v5007_v2 = vpack.c.bf16 %v5005_v23, %v5006_v35  ;;  %v5009_v29 = vld [vmem:[#allocation82_spill] sm:$0xff]  ;;  %v5010_v10 = vld [vmem:[#allocation80_spill] sm:$0xff] }
 0x400   :  { %v1494_v30 = vmul.f32 %v4987_v12, %v1445_v0  ;;  %v1495_v8 = vmul.f32 %v4988_v50, %v1457_v48  ;;  %2670 = vmatpush1.bf16.msra.mxu0 %v4992_v46  ;;  %v1591_v28 = vmul.f32 %v5002_v33, %v1550_v15  ;;  %v5003_v22 = vld [vmem:[#allocation95_spill] sm:$0xff]  ;;  %v1590_v3 = vmul.f32 %v5008_v38, %v1554_v31  ;;  %v5013_v48 = vld [vmem:[#allocation73_spill] sm:$0xff]  ;;  %v5015_v46 = vld [vmem:[#allocation74_spill] sm:$0xff] }
 0x401   :  { %2672 = vmatprep.subr.bf16.mxu0 %v2671_v44  ;;  %v1639_v11 = vpop.permute.xlu1 %1638  ;;  %v5011_v44 = vpack.c.bf16 %v5009_v29, %v5010_v10  ;;  %v1593_v50 = vmul.f32 %v5013_v48, %v1558_v7  ;;  %v5016_v6 = vpack.c.bf16 %v5014_v54, %v5015_v46  ;;  %v1685_v26 = vmul.f32 %v4511_v51, %v1650_v36  ;;  %v1723_v7 = vld [vmem:[%s4727_s6 + $0x38] sm:$0xff] }
 0x402   :  { %2742 = vmatpush1.bf16.msra.mxu1 %v5000_v21  ;;  %v2745_v59 = vpack.c.bf16 %v1494_v30, %v1490_v47  ;;  %v1527_v13 = vpop.permute.xlu0 %1526  ;;  %v2743_v5 = vpack.c.bf16 %v1495_v8, %v1491_v17  ;;  %v1658_v34 = vsel %vm561_vm8, %v1639_v11, %v4994_v37  ;;  %v5012_v47 = vld [vmem:[#allocation72_spill] sm:$0xff]  ;;  %v1646_v15 = vsel %vm561_vm8, %v4393_v43, %v1639_v11  ;;  %v5017_v43 = vld [vmem:[#allocation81_spill] sm:$0xff] }
 0x403   :  { %v1551_v45 = vsel %vm517_vm7, %v1527_v13, %v5003_v22  ;;  %v1555_v16 = vsel %vm517_vm7, %v5004_v14, %v1527_v13  ;;  %v1592_v0 = vmul.f32 %v5012_v47, %v1546_v1  ;;  %v1687_v30 = vmul.f32 %v4546_v56, %v1658_v34 }
 0x404   :  { %v1595_v4 = vmul.f32 %v5002_v33, %v1551_v45  ;;  %2674 = vmatpush1.bf16.msra.mxu0 %v2673_v40  ;;  %2744 = vmatprep.subr.bf16.mxu1 %v2743_v5  ;;  %v1594_v57 = vmul.f32 %v5008_v38, %v1555_v16  ;;  %v1688_v37 = vmul.f32 %v4502_v63, %v1655_v32  ;;  %v1719_v16 = vld [vmem:[%s4727_s6 + $0x18] sm:$0xff]  ;;  %v1722_v38 = vld [vmem:[%s4727_s6 + $0x30] sm:$0xff] }
 0x405   :  { %2676 = vmatprep.subr.bf16.mxu0 %v5007_v2  ;;  %v4583_v20 = vpop.permute.xlu1 %1618  ;;  %v1647_v9 = vsel %vm561_vm8, %v4419_v39, %v4425_v18  ;;  %v5019_v55 = vpack.c.bf16 %v5017_v43, %v5018_v49  ;;  %v1691_v21 = vmul.f32 %v4546_v56, %v1659_v60  ;;  %v1686_v32 = vmul.f32 %v4514_v24, %v1646_v15  ;;  %v1716_v18 = vld [vmem:[%s4727_s6] sm:$0xff] }
 0x406   :  { %2746 = vmatpush1.bf16.msra.mxu1 %v2745_v59  ;;  %v1543_v58 = vpop.permute.xlu0 %1542  ;;  %v2679_v12 = vpack.c.bf16 %v1595_v4, %v1591_v28  ;;  %v2681_v11 = vpack.c.bf16 %v1594_v57, %v1590_v3  ;;  %v2683_v13 = vpack.c.bf16 %v1689_v42, %v1685_v26  ;;  %v1684_v5 = vmul.f32 %v4502_v63, %v1654_v62 }
 0x407   :  { %2748 = vmatprep.subr.bf16.mxu1 %v5011_v44  ;;  %v1547_v17 = vsel %vm517_vm7, %v5003_v22, %v1543_v58  ;;  %v1559_v25 = vsel %vm517_vm7, %v1543_v58, %v5004_v14  ;;  %v2755_v39 = vpack.c.bf16 %v1691_v21, %v1687_v30  ;;  %v1690_v52 = vmul.f32 %v4514_v24, %v1647_v9  ;;  %v1720_v22 = vld [vmem:[%s4727_s6 + $0x20] sm:$0xff] }
 0x408   :  { %v1596_v8 = vmul.f32 %v5012_v47, %v1547_v17  ;;  %v1597_v41 = vmul.f32 %v5013_v48, %v1559_v25  ;;  %2678 = vmatpush1.bf16.msra.mxu0 %v5016_v6  ;;  %v2685_v33 = vpack.c.bf16 %v1688_v37, %v1684_v5  ;;  %v1724_v17 = vld [vmem:[%s4727_s6 + $0x40] sm:$0xff]  ;;  %v1727_v25 = vld [vmem:[%s4727_s6 + $0x58] sm:$0xff] }
 0x409   :  { %2680 = vmatprep.subr.bf16.mxu0 %v2679_v12  ;;  %v1627_v53 = vpop.permute.xlu1 %1626  ;;  %v2757_v62 = vpack.c.bf16 %v1690_v52, %v1686_v32 }
 0x40a   :  { %2750 = vmatpush1.bf16.msra.mxu1 %v5019_v55  ;;  %v2753_v19 = vpack.c.bf16 %v1596_v8, %v1592_v0  ;;  %v1621_v40 = vpop.permute.xlu0 %1620  ;;  %v2751_v59 = vpack.c.bf16 %v1597_v41, %v1593_v50  ;;  %v1656_v45 = vsel %vm561_vm8, %v4583_v20, %v1627_v53  ;;  %v1725_v0 = vld [vmem:[%s4727_s6 + $0x48] sm:$0xff] }
 0x40b   :  { %v1692_v36 = vmul.f32 %v4502_v63, %v1656_v45 }
 0x40c   :  { %2682 = vmatpush1.bf16.msra.mxu0 %v2681_v11  ;;  %2752 = vmatprep.subr.bf16.mxu1 %v2751_v59 }
 0x40d   :  { %2684 = vmatprep.subr.bf16.mxu0 %v2683_v13  ;;  %v1635_v31 = vpop.permute.xlu1 %1634 }
 0x40e   :  { %2754 = vmatpush1.bf16.msra.mxu1 %v2753_v19  ;;  %v1637_v28 = vpop.permute.xlu0 %1636  ;;  %v1652_v14 = vsel %vm561_vm8, %v1627_v53, %v1635_v31 }
 0x40f   :  { %2756 = vmatprep.subr.bf16.mxu1 %v2755_v39  ;;  %1974 = vmatmul.mubr.f32.vlgmr.msra.gmra.mrb[10].mxu0 %v1716_v18  ;;  %v1693_v42 = vmul.f32 %v4511_v51, %v1652_v14 }
 0x410   :  { %2686 = vmatpush1.bf16.msra.mxu0 %v2685_v33  ;;  %1979 = vmatprep.mubr.f32.mxu0 %v1720_v22 }
 0x411   :  { %2152 = vmatmul.mubr.f32.vlgmr.msra.gmra.mrb[10].mxu1 %v1716_v18  ;;  %v1643_v1 = vpop.permute.xlu1 %1642 }
 0x412   :  { %2758 = vmatpush1.bf16.msra.mxu1 %v2757_v62  ;;  %v1629_v4 = vpop.permute.xlu0 %1628  ;;  %2157 = vmatprep.mubr.f32.mxu1 %v1720_v22  ;;  %v1648_v35 = vsel %vm561_vm8, %v1635_v31, %v1643_v1  ;;  %v1660_v3 = vsel %vm561_vm8, %v1643_v1, %v4583_v20 }
 0x413   :  { %v1653_v34 = vsel %vm561_vm8, %v1629_v4, %v1637_v28  ;;  %v1657_v23 = vsel %vm561_vm8, %v1621_v40, %v1629_v4  ;;  %1980 = vmatmul.mubr.f32.gmra.mrb[12].mxu0 %v1719_v16  ;;  %v1695_v12 = vmul.f32 %v4546_v56, %v1660_v3 }
 0x414   :  { %v1696_v2 = vmul.f32 %v4502_v63, %v1657_v23  ;;  %v1697_v60 = vmul.f32 %v4511_v51, %v1653_v34  ;;  %1985 = vmatprep.mubr.f32.mxu0 %v1723_v7  ;;  %v1726_v63 = vld [vmem:[%s4727_s6 + $0x50] sm:$0xff]  ;;  %v1694_v51 = vmul.f32 %v4514_v24, %v1648_v35 }
 0x415   :  { %2158 = vmatmul.mubr.f32.gmra.mrb[12].mxu1 %v1719_v16 }
 0x416   :  { %2163 = vmatprep.mubr.f32.mxu1 %v1723_v7  ;;  %v2689_v57 = vpack.c.bf16 %v1696_v2, %v1692_v36  ;;  %v1645_v29 = vpop.permute.xlu0 %1644  ;;  %v2687_v10 = vpack.c.bf16 %v1697_v60, %v1693_v42 }
 0x417   :  { %v1649_v44 = vsel %vm561_vm8, %v1637_v28, %v1645_v29  ;;  %v1661_v58 = vsel %vm561_vm8, %v1645_v29, %v1621_v40  ;;  %1986 = vmatmul.mubr.f32.gmra.mrb[14].mxu0 %v1722_v38 }
 0x418   :  { %v1698_v20 = vmul.f32 %v4514_v24, %v1649_v44  ;;  %v1699_v47 = vmul.f32 %v4546_v56, %v1661_v58  ;;  %2688 = vmatprep.subr.bf16.mxu0 %v2687_v10  ;;  %1991 = vmatprep.mubr.f32.mxu0 %v1726_v63  ;;  %v5020_v24 = vmov 0.0   ;;  %v1721_v56 = vld [vmem:[%s4727_s6 + $0x28] sm:$0xff] }
 0x419   :  { %2164 = vmatmul.mubr.f32.gmra.mrb[14].mxu1 %v1722_v38  ;;  %2690 = vmatpush1.bf16.msra.mxu0 %v2689_v57 }
 0x41a   :  { %v2761_v48 = vpack.c.bf16 %v1698_v20, %v1694_v51  ;;  %2169 = vmatprep.mubr.f32.mxu1 %v1726_v63  ;;  %v2759_v50 = vpack.c.bf16 %v1699_v47, %v1695_v12 }
 0x41b   :  { %1992 = vmatmul.mubr.f32.gmra.mrb[16].mxu0 %v1725_v0 }
 0x41c   :  { %2760 = vmatprep.subr.bf16.mxu1 %v2759_v50  ;;  %2062 = vmatprep.mubr.f32.mxu0 %v5020_v24 }
 0x41d   :  { %2170 = vmatmul.mubr.f32.gmra.mrb[16].mxu1 %v1725_v0 }
 0x41e   :  { %2762 = vmatpush1.bf16.msra.mxu1 %v2761_v48  ;;  %2240 = vmatprep.mubr.f32.mxu1 %v5020_v24 }
 0x41f   :  { %2577 = vmatmul.mubr.msk.f32.vlgmr.msra.gmra.mrb[10].mxu0 %vm1896_vm10, %v1718_v27 }
 0x420   :  { %2068 = vmatprep.mubr.f32.mxu0 %v5020_v24 }
 0x421   :  { %2581 = vmatmul.mubr.msk.f32.vlgmr.msra.gmra.mrb[10].mxu1 %vm1896_vm10, %v1718_v27 }
 0x422   :  { %2246 = vmatprep.mubr.f32.mxu1 %v5020_v24  ;;  %v1879_v15 = vpop.permute.xlu1 %1878 }
 0x423   :  { %2578 = vmatmul.mubr.msk.f32.gmra.mrb[12].mxu0 %vm1896_vm10, %v1721_v56 }
 0x424   :  { %2074 = vmatprep.mubr.f32.mxu0 %v5020_v24 }
 0x425   :  { %2582 = vmatmul.mubr.msk.f32.gmra.mrb[12].mxu1 %vm1896_vm10, %v1721_v56 }
 0x426   :  { %2252 = vmatprep.mubr.f32.mxu1 %v5020_v24  ;;  %v1889_v18 = vpop.permute.xlu1 %1888 }
 0x427   :  { %2579 = vmatmul.mubr.msk.f32.gmra.mrb[14].mxu0 %vm1896_vm10, %v1724_v17  ;;  %v1884_v9 = vpop.permute.xlu0 %1883 }
 0x428   :  { %2080 = vmatprep.mubr.f32.mxu0 %v5020_v24 }
 0x429   :  { %2583 = vmatmul.mubr.msk.f32.gmra.mrb[14].mxu1 %vm1896_vm10, %v1724_v17 }
 0x42a   :  { %2258 = vmatprep.mubr.f32.mxu1 %v5020_v24 }
 0x42b   :  { %2580 = vmatmul.mubr.msk.f32.gmra.mrb[16].mxu0 %vm1896_vm10, %v1727_v25  ;;  %v1894_v3 = vpop.permute.xlu0 %1893 }
 0x42c   :  { %2371 = vmatprep.mubr.f32.mxu0 %v5020_v24 }
 0x42d   :  { %2584 = vmatmul.mubr.msk.f32.gmra.mrb[16].mxu1 %vm1896_vm10, %v1727_v25 }
 0x42e   :  { %2442 = vmatprep.mubr.f32.mxu1 %v5020_v24 }
 0x4f2   :  { %v2064_v30 = vpop.f32.mrb[10].mxu0 }
 0x4f3   :  { %v2779_v8 = vadd.f32 %v2064_v30, %v1879_v15  ;;  %v2066_v41 = vpop.f32.mrb[11].mxu0 }
 0x4f4   :  { %v2242_v54 = vpop.f32.mrb[10].mxu1  ;;  %v2780_v46 = vadd.f32 %v2066_v41, %v1879_v15 }
 0x4f5   :  { %v2787_v6 = vadd.f32 %v2242_v54, %v1879_v15  ;;  %v2244_v37 = vpop.f32.mrb[11].mxu1  ;;  %v2265_v43 = vmul.f32 0.01, %v2779_v8 }
 0x4f6   :  { %v2788_v26 = vadd.f32 %v2244_v37, %v1879_v15  ;;  %v2266_v49 = vmul.f32 0.01, %v2780_v46  ;;  %v2070_v55 = vpop.f32.mrb[12].mxu0 }
 0x4f7   :  { %v2267_v53 = vmul.f32 0.01, %v2787_v6  ;;  %v2781_v21 = vadd.f32 %v2070_v55, %v1884_v9  ;;  %v2072_v11 = vpop.f32.mrb[13].mxu0  ;;  %v2281_v52 = vmax.f32 %v2779_v8, %v2265_v43 }
 0x4f8   :  { %v2248_v19 = vpop.f32.mrb[12].mxu1  ;;  %v2782_v40 = vadd.f32 %v2072_v11, %v1884_v9  ;;  %v2268_v13 = vmul.f32 0.01, %v2788_v26  ;;  %v2282_v31 = vmax.f32 %v2780_v46, %v2266_v49 }
 0x4f9   :  { %v2789_v59 = vadd.f32 %v2248_v19, %v1884_v9  ;;  %v2250_v32 = vpop.f32.mrb[13].mxu1  ;;  %v2269_v5 = vmul.f32 0.01, %v2781_v21  ;;  %v2283_v62 = vmax.f32 %v2787_v6, %v2267_v53  ;;  %v2297_v53 = vld [vmem:[%s4729_s8] sm:$0xff]  ;;  %s2952_s8 = smov [#allocation11]  }
 0x4fa   :  { %v2790_v39 = vadd.f32 %v2250_v32, %v1884_v9  ;;  %v2270_v33 = vmul.f32 0.01, %v2782_v40  ;;  %v2076_v22 = vpop.f32.mrb[14].mxu0  ;;  %v2284_v35 = vmax.f32 %v2788_v26, %v2268_v13  ;;  %s2557_s2 = sshll.u32 %s2952_s8, 4  ;;  %s2558_s2 = int_to_ptr.vmem [resolvable:$true] %s2557_s2 }
 0x4fb   :  { %v2271_v28 = vmul.f32 0.01, %v2789_v59  ;;  %v2285_v45 = vmax.f32 %v2781_v21, %v2269_v5  ;;  %v2783_v16 = vadd.f32 %v2076_v22, %v1889_v18  ;;  %v2078_v1 = vpop.f32.mrb[15].mxu0  ;;  %v2302_v21 = vpop.permute.xlu1 %2301  ;;  %s2906_s3 = scalar_lea.vmem %s2558_s2, 64  ;;  %p2911_p11 = scmp.lt.s32.totalorder %s2558_s2, %s2558_s2 }
 0x4fc   :  { %v2272_v14 = vmul.f32 0.01, %v2790_v39  ;;  %v2254_v7 = vpop.f32.mrb[14].mxu1  ;;  %v2286_v4 = vmax.f32 %v2782_v40, %v2270_v33  ;;  %v2784_v42 = vadd.f32 %v2078_v1, %v1889_v18  ;;  %v2461_v22 = vpop.permute.xlu0 %2460  ;;  %p2907_p10 = scmp.ne.s32.totalorder %s2558_s2, %s2906_s3  ;;  %p2912_p12 = scmp.lt.s32.totalorder %s2906_s3, %s2906_s3 }
 0x4fd   :  { %v2287_v36 = vmax.f32 %v2789_v59, %v2271_v28  ;;  %v2791_v34 = vadd.f32 %v2254_v7, %v1889_v18  ;;  %v2256_v23 = vpop.f32.mrb[15].mxu1  ;;  %v2765_v2 = vpack.c.bf16 %v2285_v45, %v2281_v52  ;;  %v2273_v63 = vmul.f32 0.01, %v2783_v16 }
 0x4fe   :  { %v2288_v60 = vmax.f32 %v2790_v39, %v2272_v14  ;;  %v2792_v38 = vadd.f32 %v2256_v23, %v1889_v18  ;;  %v2082_v29 = vpop.f32.mrb[16].mxu0  ;;  %v2763_v10 = vpack.c.bf16 %v2286_v4, %v2282_v31  ;;  %v2274_v20 = vmul.f32 0.01, %v2784_v42  ;;  %p2913_p13 = por %p2912_p12, %p2911_p11 }
 0x4ff   :  { %v2773_v57 = vpack.c.bf16 %v2287_v36, %v2283_v62  ;;  %v2785_v51 = vadd.f32 %v2082_v29, %v1894_v3  ;;  %v2084_v44 = vpop.f32.mrb[17].mxu0  ;;  %v2275_v47 = vmul.f32 0.01, %v2791_v34  ;;  %v2289_v15 = vmax.f32 %v2783_v16, %v2273_v63 }
 0x500   :  { %v2260_v58 = vpop.f32.mrb[16].mxu1  ;;  %v2771_v12 = vpack.c.bf16 %v2288_v60, %v2284_v35  ;;  %v2786_v0 = vadd.f32 %v2084_v44, %v1894_v3  ;;  %2764 = vmatprep.subr.bf16.mxu0 %v2763_v10  ;;  %v2276_v27 = vmul.f32 0.01, %v2792_v38  ;;  %v2290_v41 = vmax.f32 %v2784_v42, %v2274_v20  ;;  %p2914_p0 = pnand %p2913_p13, %p2907_p10 }
 0x501   :  { %v2793_v48 = vadd.f32 %v2260_v58, %v1894_v3  ;;  %v2262_v50 = vpop.f32.mrb[17].mxu1  ;;  %v2277_v24 = vmul.f32 0.01, %v2785_v51  ;;  %2766 = vmatpush1.bf16.msra.mxu0 %v2765_v2  ;;  %v2291_v54 = vmax.f32 %v2791_v34, %v2275_v47 }
 0x502   :  { %v2794_v56 = vadd.f32 %v2262_v50, %v1894_v3  ;;  %2772 = vmatprep.subr.bf16.mxu1 %v2771_v12  ;;  %v2278_v17 = vmul.f32 0.01, %v2786_v0  ;;  %v2292_v37 = vmax.f32 %v2792_v38, %v2276_v27 }
 0x503   :  { %v2279_v25 = vmul.f32 0.01, %v2793_v48  ;;  %2774 = vmatpush1.bf16.msra.mxu1 %v2773_v57  ;;  %v2293_v30 = vmax.f32 %v2785_v51, %v2277_v24  ;;  %v2495_v51 = vpop.permute.xlu1 %2494 }
 0x504   :  { %v2280_v8 = vmul.f32 0.01, %v2794_v56  ;;  %v2294_v46 = vmax.f32 %v2786_v0, %v2278_v17 }
 0x505   :  { %v2295_v6 = vmax.f32 %v2793_v48, %v2279_v25  ;;  %v2769_v26 = vpack.c.bf16 %v2293_v30, %v2289_v15  ;;  %v2500_v48 = vrot.slane %v2495_v51, %v4977_v61 }
 0x506   :  { %v2296_v9 = vmax.f32 %v2794_v56, %v2280_v8  ;;  %v2767_v49 = vpack.c.bf16 %v2294_v46, %v2290_v41  ;;  %v2951_v41 = vmov 1966171168  }
 0x507   :  { %v2777_v43 = vpack.c.bf16 %v2295_v6, %v2291_v54  ;;  %v2524_v54 = vunpack.c.l.s4 %v2951_v41 }
 0x508   :  { %v2775_v55 = vpack.c.bf16 %v2296_v9, %v2292_v37  ;;  %2768 = vmatprep.subr.bf16.mxu0 %v2767_v49 }
 0x509   :  { %2770 = vmatpush1.bf16.msra.mxu0 %v2769_v26  ;;  %v2525_v6 = vunpack.c.0.s8 %v2524_v54 }
 0x50a   :  { %2776 = vmatprep.subr.bf16.mxu1 %v2775_v55 }
 0x50b   :  { %2778 = vmatpush1.bf16.msra.mxu1 %v2777_v43 }
 0x50c   :  { %2585 = vmatmul.mubr.msk.f32.vlgmr.msra.gmra.mrb[18].mxu0 %vm1896_vm10, %v2297_v53 }
 0x50e   :  { %2586 = vmatmul.mubr.msk.f32.vlgmr.msra.gmra.mrb[18].mxu1 %vm1896_vm10, %v2297_v53 }
 0x5df   :  { %v2373_v11 = vpop.f32.mrb[18].mxu0 }
 0x5e0   :  { %v2374_v19 = vadd.f32 %v2373_v11, %v2302_v21  ;;  %v2375_v40 = vpop.f32.mrb[19].mxu0  ;;  %v5021_v11 = vld [vmem:[#allocation15_spill] sm:$0xff] }
 0x5e1   :  { %v2444_v59 = vpop.f32.mrb[18].mxu1  ;;  %v2376_v32 = vadd.f32 %v2375_v40, %v2302_v21 }
 0x5e2   :  { %v2445_v13 = vadd.f32 %v2444_v59, %v2302_v21  ;;  %v2446_v5 = vpop.f32.mrb[19].mxu1  ;;  %v2449_v39 = vmul.f32 0.01, %v2374_v19 }
 0x5e3   :  { %v2447_v18 = vadd.f32 %v2446_v5, %v2302_v21  ;;  %v2450_v52 = vmul.f32 0.01, %v2376_v32 }
 0x5e4   :  { %v2451_v31 = vmul.f32 0.01, %v2445_v13  ;;  %v2453_v33 = vmax.f32 %v2374_v19, %v2449_v39  ;;  %v2528_v19 = vsub.s32 %v2525_v6, %v5021_v11 }
 0x5e5   :  { %v2452_v28 = vmul.f32 0.01, %v2447_v18  ;;  %v2454_v62 = vmax.f32 %v2376_v32, %v2450_v52  ;;  %v5022_v52 = vlaneseq }
 0x5e6   :  { %v2455_v45 = vmax.f32 %v2445_v13, %v2451_v31  ;;  %v2463_v14 = vmul.f32 %v2461_v22, %v2453_v33 }
 0x5e7   :  { %v2456_v16 = vmax.f32 %v2447_v18, %v2452_v28  ;;  %v2464_v1 = vmul.f32 %v2461_v22, %v2454_v62  ;;  %vm2548_vm11 = vcmp.lt.s32.totalorder %v5022_v52, 512 }
 0x5e8   :  { %v2465_v7 = vmul.f32 %v2461_v22, %v2455_v45  ;;  %v2467_v4 = vrot.slane %v2463_v14, 4 }
 0x5e9   :  { %v2466_v36 = vmul.f32 %v2461_v22, %v2456_v16  ;;  %v2473_v42 = vrot.slane %v2464_v1, 4 }
 0x5ea   :  { %v2479_v34 = vrot.slane %v2465_v7, 4  ;;  %v2468_v23 = vadd.f32 %v2467_v4, %v2463_v14 }
 0x5eb   :  { %v2485_v35 = vrot.slane %v2466_v36, 4  ;;  %v2474_v2 = vadd.f32 %v2473_v42, %v2464_v1 }
 0x5ec   :  { %v2480_v60 = vadd.f32 %v2479_v34, %v2465_v7  ;;  %v2469_v38 = vrot.slane %v2468_v23, 2 }
 0x5ed   :  { %v2486_v3 = vadd.f32 %v2485_v35, %v2466_v36  ;;  %v2475_v57 = vrot.slane %v2474_v2, 2 }
 0x5ee   :  { %v2481_v29 = vrot.slane %v2480_v60, 2  ;;  %v2470_v10 = vadd.f32 %v2469_v38, %v2468_v23 }
 0x5ef   :  { %v2487_v63 = vrot.slane %v2486_v3, 2  ;;  %v2476_v44 = vadd.f32 %v2475_v57, %v2474_v2 }
 0x5f0   :  { %v2482_v58 = vadd.f32 %v2481_v29, %v2480_v60  ;;  %v2471_v12 = vrot.slane %v2470_v10, 1 }
 0x5f1   :  { %v2488_v20 = vadd.f32 %v2487_v63, %v2486_v3  ;;  %v2477_v47 = vrot.slane %v2476_v44, 1 }
 0x5f2   :  { %v2483_v0 = vrot.slane %v2482_v58, 1  ;;  %v2472_v50 = vadd.f32 %v2471_v12, %v2470_v10 }
 0x5f3   :  { %v2489_v27 = vrot.slane %v2488_v20, 1  ;;  %v2478_v24 = vadd.f32 %v2477_v47, %v2476_v44 }
 0x5f4   :  { %v2484_v56 = vadd.f32 %v2483_v0, %v2482_v58  ;;  %v2501_v17 = vadd.f32 %v2500_v48, %v2472_v50 }
 0x5f5   :  { %v2490_v25 = vadd.f32 %v2489_v27, %v2488_v20  ;;  %v2502_v15 = vadd.f32 %v2500_v48, %v2478_v24 }
 0x5f6   :  { %v2503_v30 = vadd.f32 %v2500_v48, %v2484_v56  ;;  %2832 = vtanh.f32 %v2501_v17 }
 0x5f7   :  { %v2504_v8 = vadd.f32 %v2500_v48, %v2490_v25  ;;  %2834 = vtanh.f32 %v2502_v15 }
 0x5f8   :  { %2836 = vtanh.f32 %v2503_v30 }
 0x5f9   :  { %2838 = vtanh.f32 %v2504_v8 }
 0x600   :  { %v2833_v46 = vpop.eup %2832 }
 0x601   :  { %v2835_v37 = vpop.eup %2834  ;;  %v2509_v26 = vmul.f32 0.5, %v2833_v46 }
 0x602   :  { %v2837_v61 = vpop.eup %2836  ;;  %v2510_v9 = vmul.f32 0.5, %v2835_v37 }
 0x603   :  { %v2839_v43 = vpop.eup %2838  ;;  %v2511_v49 = vmul.f32 0.5, %v2837_v61  ;;  %v2513_v55 = vadd.f32 0.5, %v2509_v26 }
 0x604   :  { %v2512_v53 = vmul.f32 0.5, %v2839_v43  ;;  %v2514_v21 = vadd.f32 0.5, %v2510_v9 }
 0x605   :  { %v2515_v40 = vadd.f32 0.5, %v2511_v49 }
 0x606   :  { %v2516_v59 = vadd.f32 0.5, %v2512_v53  ;;  %v2521_v32 = vcombine.low %v2513_v55, %v2514_v21 }
 0x608   :  { %v2522_v13 = vcombine.low %v2515_v40, %v2516_v59  ;;  %v2529_v5 = vrot.slane %v2521_v32, %v2528_v19 }
 0x60a   :  { %v2536_v39 = vrot.slane %v2522_v13, %v2528_v19 }
 0x60c   :  { %v2537_v18 = vcombine.low %v2529_v5, %v2536_v39 }
 0x60e   :  { %v2544_v31 = vrot.slane %v2537_v18, %v2528_v19 }
 0x610   :  { %2550 = vst.msk [vmem:[#allocation11] sm:$0xf] %vm2548_vm11, %v2544_v31 }
 0x611   :  { %2917 = shalt.err (!%p2914_p0)
}
 0x612   :  { %s2918_s29 = scalar_lea.hbm %s4733_s12, 64 }
 0x613   :  { %p2919_p1 = scmp.ne.s32.totalorder %s4733_s12, %s2918_s29  ;;  %p2922_p2 = scmp.lt.u32.totalorder %s2918_s29, %s4733_s12 }
 0x615   :  { %p2924_p3 = pnand %p2922_p2, %p2919_p1 }
 0x617   :  { %2927 = shalt.err (!%p2924_p3)
}
 0x618   :  { %2560 = dma.vmem_to_hbm [thread:$0]  %s2558_s2, 64, %s4733_s12, [#allocation7]  }
 0x619   :  { %2932 = dma.done.wait [#allocation7], 64  }
 0x61a   :  { %2933 = vsyncadd [#allocation7], 4294967232 }
 0x61b   :  { %2564 = vsyncpa [#allocation6], 1 }
 0x61c   :  { %2565 = vsyncpa [#allocation9], 1 }
 0x61d   :  { %2566 = vsyncpa [#allocation7], 1 }

</bundles_post_ra>
